<compile_context>
chip_gen: v7x
topology: tpu7x:2x2x1
jax: 0.10.0
libtpu: 0.0.40
codegen_flags: <defaults>
</compile_context>

<pallas_src>
import jax
import jax.numpy as jnp
from jax import lax
from jax.experimental import pallas as pl
from jax.experimental.pallas import tpu as pltpu
import numpy as np

INPUT_SIZE = 10
HIDDEN = 64
FC1 = 32
OUT = 6
OUT_PAD = 128  # lane-dense output slab; fc2 columns zero-padded to 128


def _lstm_mlp_kernel(x_ref,                       # (T*Bb, INPUT_SIZE) time-major
                     wih1_ref, whh1_ref, b1_ref,  # (10,256), (64,256), (1,256)
                     wih2_ref, whh2_ref, b2_ref,  # (64,256), (64,256), (1,256)
                     wfc1_ref, bfc1_ref,          # (64,32), (1,32)
                     wfc2_ref, bfc2_ref,          # (32,128), (1,128) zero-padded
                     out_ref,                     # (Bb, 128)
                     gx_ref,                      # VMEM scratch (T*Bb, 256)
                     h1_ref):                     # VMEM scratch (T*Bb, 64)
    Bb = out_ref.shape[0]
    T = x_ref.shape[0] // Bb
    H = HIDDEN
    unroll = True if T <= 32 else 8

    def cell(gx_t, h_prev, c_prev, whh_ref):
        # Gate columns pre-ordered [ i | f | o | g ].  W_hh is re-loaded from
        # VMEM each step (ld slots have slack) rather than held in 16 vregs
        # across the unrolled loop, which caused spills at block_b=128.
        gates = gx_t + jnp.dot(h_prev, whh_ref[...],
                               preferred_element_type=jnp.float32)
        sig = jax.nn.sigmoid(gates[:, :3 * H])     # one EUP slab: i, f, o
        g = jnp.tanh(gates[:, 3 * H:])             # one EUP slab: g
        c = sig[:, H:2 * H] * c_prev + sig[:, :H] * g
        h = sig[:, 2 * H:3 * H] * jnp.tanh(c)
        return h, c

    zeros = jnp.zeros((Bb, H), jnp.float32)

    # ---- layer 1: hoisted input projection (one MXU pass), then recurrence ----
    gx_ref[...] = (jnp.dot(x_ref[...], wih1_ref[...],
                           preferred_element_type=jnp.float32) + b1_ref[...])

    def step1(t, carry):
        off = pl.multiple_of(t * Bb, Bb)
        h, c = cell(gx_ref[pl.ds(off, Bb), :], carry[0], carry[1], whh1_ref)
        h1_ref[pl.ds(off, Bb), :] = h
        return (h, c)

    lax.fori_loop(0, T, step1, (zeros, zeros), unroll=unroll)

    # ---- layer 2: hoisted input projection over all layer-1 hiddens ----
    gx_ref[...] = (jnp.dot(h1_ref[...], wih2_ref[...],
                           preferred_element_type=jnp.float32) + b2_ref[...])

    def step2(t, carry):
        off = pl.multiple_of(t * Bb, Bb)
        return cell(gx_ref[pl.ds(off, Bb), :], carry[0], carry[1], whh2_ref)

    h2, _ = lax.fori_loop(0, T, step2, (zeros, zeros), unroll=unroll)

    # ---- head: fc1 + ReLU, fc2 (lane-padded to 128) on last layer-2 hidden ----
    z = jnp.dot(h2, wfc1_ref[...], preferred_element_type=jnp.float32) + bfc1_ref[...]
    z = jnp.maximum(z, 0.0)
    y = jnp.dot(z, wfc2_ref[...], preferred_element_type=jnp.float32) + bfc2_ref[...]
    out_ref[...] = y.astype(out_ref.dtype)   # full 128-lane, unmasked store


def _round_up(x, m):
    return (x + m - 1) // m * m


def _cdiv(a, b):
    return -(-a // b)


def _reorder_gates(w):
    """PyTorch LSTM gate order [i, f, g, o] -> kernel order [i, f, o, g] (rows)."""
    H = HIDDEN
    return jnp.concatenate([w[:2 * H], w[3 * H:4 * H], w[2 * H:3 * H]], axis=0)


def _choose_blocking(B, T):
    """Pick (G, block_b): minimal padding, >=2 blocks for megacore when batch is
    big enough, per-block VMEM scratch bounded for long T."""
    b_pad0 = _round_up(max(B, 8), 8)
    G = _cdiv(b_pad0, 128)                 # block_b <= 128, minimal padding
    if b_pad0 > 16 and G < 2:
        G = 2                              # feed both v7x TensorCores
    scratch_per_row = T * (4 * HIDDEN + HIDDEN) * 4   # gx + h1 bytes per batch row
    SCRATCH_BUDGET = 20 * 1024 * 1024
    # TODO(synk): for very long T, add a time-chunk "arbitrary" grid axis instead
    # of only shrinking block_b.
    block_b = _round_up(_cdiv(b_pad0, G), 8)
    while block_b > 8 and block_b * scratch_per_row > SCRATCH_BUDGET:
        G += 1
        block_b = _round_up(_cdiv(b_pad0, G), 8)
    return G, block_b


def packet_prioritizer_forward(x, params):
    """x: (B, T, INPUT_SIZE) batch_first, float32. Returns (B, 6)."""
    B, T, F = x.shape
    assert F == INPUT_SIZE

    G, block_b = _choose_blocking(B, T)
    B_pad = G * block_b

    x_p = jnp.zeros((B_pad, T, F), x.dtype).at[:B].set(x)
    # Per grid block: time-major, pre-flattened to (T*block_b, F). Row t*block_b+j
    # within block g corresponds to x[g*block_b + j, t, :].
    x_blk = (x_p.reshape(G, block_b, T, F)
                 .transpose(0, 2, 1, 3)
                 .reshape(G * T * block_b, F))

    # Pre-transpose weights to (in, out); reorder gates; fold the two LSTM biases.
    wih1 = _reorder_gates(params["weight_ih_l0"]).T                          # (10, 256)
    whh1 = _reorder_gates(params["weight_hh_l0"]).T                          # (64, 256)
    b1 = _reorder_gates(params["bias_ih_l0"] + params["bias_hh_l0"])[None, :]
    wih2 = _reorder_gates(params["weight_ih_l1"]).T                          # (64, 256)
    whh2 = _reorder_gates(params["weight_hh_l1"]).T                          # (64, 256)
    b2 = _reorder_gates(params["bias_ih_l1"] + params["bias_hh_l1"])[None, :]
    wfc1 = params["fc1_w"].T                                                 # (64, 32)
    bfc1 = params["fc1_b"][None, :]                                          # (1, 32)
    # Zero-pad fc2 to 128 output lanes so the final store is lane-dense.
    wfc2 = jnp.zeros((FC1, OUT_PAD), jnp.float32).at[:, :OUT].set(params["fc2_w"].T)
    bfc2 = jnp.zeros((1, OUT_PAD), jnp.float32).at[0, :OUT].set(params["fc2_b"])

    rep = lambda shape: pl.BlockSpec(shape, lambda b: (0, 0))   # replicated weight

    # Explicit VMEM budget: scratch + double-buffered input/output + weights.
    scratch_bytes = T * block_b * (4 * HIDDEN + HIDDEN) * 4
    io_bytes = 2 * (T * block_b * INPUT_SIZE * 4) + 2 * (block_b * OUT_PAD * 4)
    w_bytes = 4 * ((INPUT_SIZE + 3 * HIDDEN + 2) * 4 * HIDDEN
                   + HIDDEN * FC1 + FC1 + FC1 * OUT_PAD + OUT_PAD)
    vmem_limit = int(min(max(scratch_bytes + io_bytes + 2 * w_bytes + (4 << 20),
                             32 << 20), 100 << 20))

    out = pl.pallas_call(
        _lstm_mlp_kernel,
        out_shape=jax.ShapeDtypeStruct((B_pad, OUT_PAD), jnp.float32),
        grid_spec=pltpu.PrefetchScalarGridSpec(
            num_scalar_prefetch=0,
            grid=(G,),
            in_specs=[
                pl.BlockSpec((T * block_b, INPUT_SIZE), lambda b: (b, 0)),
                rep((INPUT_SIZE, 4 * HIDDEN)),
                rep((HIDDEN, 4 * HIDDEN)),
                rep((1, 4 * HIDDEN)),
                rep((HIDDEN, 4 * HIDDEN)),
                rep((HIDDEN, 4 * HIDDEN)),
                rep((1, 4 * HIDDEN)),
                rep((HIDDEN, FC1)),
                rep((1, FC1)),
                rep((FC1, OUT_PAD)),
                rep((1, OUT_PAD)),
            ],
            out_specs=pl.BlockSpec((block_b, OUT_PAD), lambda b: (b, 0)),
            scratch_shapes=[
                pltpu.VMEM((T * block_b, 4 * HIDDEN), jnp.float32),
                pltpu.VMEM((T * block_b, HIDDEN), jnp.float32),
            ],
        ),
        compiler_params=pltpu.CompilerParams(
            dimension_semantics=("parallel",),
            vmem_limit_bytes=vmem_limit),
    )(x_blk, wih1, whh1, b1, wih2, whh2, b2, wfc1, bfc1, wfc2, bfc2)
    return out[:B, :OUT]


def _reference_forward(x, params):
    """Pure-JAX reference replicating torch.nn.LSTM semantics."""
    B, T, _ = x.shape
    H = HIDDEN

    def run_layer(inp, wih, whh, bih, bhh):
        h = jnp.zeros((B, H), jnp.float32)
        c = jnp.zeros((B, H), jnp.float32)
        outs = []
        for t in range(T):
            g = inp[:, t, :] @ wih.T + bih + h @ whh.T + bhh
            i = jax.nn.sigmoid(g[:, 0 * H:1 * H])
            f = jax.nn.sigmoid(g[:, 1 * H:2 * H])
            gg = jnp.tanh(g[:, 2 * H:3 * H])
            o = jax.nn.sigmoid(g[:, 3 * H:4 * H])
            c = f * c + i * gg
            h = o * jnp.tanh(c)
            outs.append(h)
        return jnp.stack(outs, axis=1)

    l1 = run_layer(x, params["weight_ih_l0"], params["weight_hh_l0"],
                   params["bias_ih_l0"], params["bias_hh_l0"])
    l2 = run_layer(l1, params["weight_ih_l1"], params["weight_hh_l1"],
                   params["bias_ih_l1"], params["bias_hh_l1"])
    z = jnp.maximum(l2[:, -1, :] @ params["fc1_w"].T + params["fc1_b"], 0.0)
    return z @ params["fc2_w"].T + params["fc2_b"]


def _init_params(key):
    """Deterministic synthetic parameters with PyTorch-convention shapes."""
    ks = jax.random.split(key, 12)

    def u(k, shape, fan):
        bound = 1.0 / np.sqrt(fan)
        return jax.random.uniform(k, shape, jnp.float32, -bound, bound)

    return {
        "weight_ih_l0": u(ks[0], (4 * HIDDEN, INPUT_SIZE), HIDDEN),
        "weight_hh_l0": u(ks[1], (4 * HIDDEN, HIDDEN), HIDDEN),
        "bias_ih_l0":   u(ks[2], (4 * HIDDEN,), HIDDEN),
        "bias_hh_l0":   u(ks[3], (4 * HIDDEN,), HIDDEN),
        "weight_ih_l1": u(ks[4], (4 * HIDDEN, HIDDEN), HIDDEN),
        "weight_hh_l1": u(ks[5], (4 * HIDDEN, HIDDEN), HIDDEN),
        "bias_ih_l1":   u(ks[6], (4 * HIDDEN,), HIDDEN),
        "bias_hh_l1":   u(ks[7], (4 * HIDDEN,), HIDDEN),
        "fc1_w":        u(ks[8], (FC1, HIDDEN), HIDDEN),
        "fc1_b":        u(ks[9], (FC1,), HIDDEN),
        "fc2_w":        u(ks[10], (OUT, FC1), FC1),
        "fc2_b":        u(ks[11], (OUT,), FC1),
    }


if __name__ == "__main__":
    key = jax.random.PRNGKey(0)
    pkey, xkey = jax.random.split(key)
    params = _init_params(pkey)

    B, T = 2, 8
    x = jax.random.normal(xkey, (B, T, INPUT_SIZE), jnp.float32)

    out = packet_prioritizer_forward(x, params)
    out = jax.block_until_ready(out)

    ref = jax.block_until_ready(_reference_forward(x, params))
    assert out.shape == (B, OUT)
    np.testing.assert_allclose(np.asarray(out), np.asarray(ref), rtol=1e-4, atol=1e-4)

    print("KERNEL_OK")
</pallas_src>

<mosaic_0001>
module attributes {stable_mosaic.version = 11 : i64} {
  func.func @_lstm_mlp_kernel(%arg0: i32, %arg1: memref<64x10xf32, #tpu.memory_space<vmem>>, %arg2: memref<10x256xf32, #tpu.memory_space<vmem>>, %arg3: memref<64x256xf32, #tpu.memory_space<vmem>>, %arg4: memref<1x256xf32, #tpu.memory_space<vmem>>, %arg5: memref<64x256xf32, #tpu.memory_space<vmem>>, %arg6: memref<64x256xf32, #tpu.memory_space<vmem>>, %arg7: memref<1x256xf32, #tpu.memory_space<vmem>>, %arg8: memref<64x32xf32, #tpu.memory_space<vmem>>, %arg9: memref<1x32xf32, #tpu.memory_space<vmem>>, %arg10: memref<32x128xf32, #tpu.memory_space<vmem>>, %arg11: memref<1x128xf32, #tpu.memory_space<vmem>>, %arg12: memref<8x128xf32, #tpu.memory_space<vmem>>, %arg13: memref<64x256xf32, #tpu.memory_space<vmem>>, %arg14: memref<64x64xf32, #tpu.memory_space<vmem>>) attributes {dimension_semantics = [#tpu.dimension_semantics<parallel>], iteration_bounds = array<i64: 1>, scalar_prefetch = 0 : i64, scratch_operands = 2 : i64, tpu.core_type = #tpu.core_type<tc>, window_params = [{transform_indices = @transform_0, window_bounds = array<i64: 64, 10>}, {pipeline_mode = #tpu.pipeline_mode<synchronous>, transform_indices = @transform_1, window_bounds = array<i64: 10, 256>}, {pipeline_mode = #tpu.pipeline_mode<synchronous>, transform_indices = @transform_2, window_bounds = array<i64: 64, 256>}, {pipeline_mode = #tpu.pipeline_mode<synchronous>, transform_indices = @transform_3, window_bounds = array<i64: 1, 256>}, {pipeline_mode = #tpu.pipeline_mode<synchronous>, transform_indices = @transform_4, window_bounds = array<i64: 64, 256>}, {pipeline_mode = #tpu.pipeline_mode<synchronous>, transform_indices = @transform_5, window_bounds = array<i64: 64, 256>}, {pipeline_mode = #tpu.pipeline_mode<synchronous>, transform_indices = @transform_6, window_bounds = array<i64: 1, 256>}, {pipeline_mode = #tpu.pipeline_mode<synchronous>, transform_indices = @transform_7, window_bounds = array<i64: 64, 32>}, {pipeline_mode = #tpu.pipeline_mode<synchronous>, transform_indices = @transform_8, window_bounds = array<i64: 1, 32>}, {pipeline_mode = #tpu.pipeline_mode<synchronous>, transform_indices = @transform_9, window_bounds = array<i64: 32, 128>}, {pipeline_mode = #tpu.pipeline_mode<synchronous>, transform_indices = @transform_10, window_bounds = array<i64: 1, 128>}, {transform_indices = @transform_11, window_bounds = array<i64: 8, 128>}]} {
    %cst = arith.constant 0.000000e+00 : f32
    %0 = vector.broadcast %cst : f32 to vector<8x64xf32>
    %c0 = arith.constant 0 : index
    %c0_0 = arith.constant 0 : index
    %1 = vector.load %arg1[%c0, %c0_0] : memref<64x10xf32, #tpu.memory_space<vmem>>, vector<64x10xf32>
    %c0_1 = arith.constant 0 : index
    %c0_2 = arith.constant 0 : index
    %2 = vector.load %arg2[%c0_1, %c0_2] : memref<10x256xf32, #tpu.memory_space<vmem>>, vector<10x256xf32>
    %cst_3 = arith.constant dense<0.000000e+00> : vector<64x256xf32>
    %3 = tpu.matmul %1, %2, %cst_3 {dimension_numbers = #tpu.dot_dimension_numbers<[1], [0], [0], [1], [0, 0, 1, 1], [], []>} : vector<64x10xf32>, vector<10x256xf32>, vector<64x256xf32> -> vector<64x256xf32>
    %c0_4 = arith.constant 0 : index
    %c0_5 = arith.constant 0 : index
    %4 = vector.load %arg4[%c0_4, %c0_5] : memref<1x256xf32, #tpu.memory_space<vmem>>, vector<1x256xf32>
    %5 = vector.broadcast %4 : vector<1x256xf32> to vector<64x256xf32>
    %6 = arith.addf %3, %5 : vector<64x256xf32>
    %c0_6 = arith.constant 0 : index
    %c0_7 = arith.constant 0 : index
    %7 = vector.load %arg13[%c0_6, %c0_7] : memref<64x256xf32, #tpu.memory_space<vmem>>, vector<64x256xf32>
    tpu.vector_store %arg13[%c0_6, %c0_7], %6 {strides = array<i32>} : memref<64x256xf32, #tpu.memory_space<vmem>>, vector<64x256xf32>,
    %c0_i32 = arith.constant 0 : i32
    %c8_i32 = arith.constant 8 : i32
    %8 = arith.muli %c0_i32, %c8_i32 : i32
    %9 = tpu.assume_multiple %8, 8 : i32
    %10 = arith.index_cast %9 : i32 to index
    %c0_8 = arith.constant 0 : index
    %11 = vector.load %arg13[%10, %c0_8] : memref<64x256xf32, #tpu.memory_space<vmem>>, vector<8x256xf32>
    %c0_9 = arith.constant 0 : index
    %c0_10 = arith.constant 0 : index
    %12 = vector.load %arg3[%c0_9, %c0_10] : memref<64x256xf32, #tpu.memory_space<vmem>>, vector<64x256xf32>
    %cst_11 = arith.constant dense<0.000000e+00> : vector<8x256xf32>
    %13 = tpu.matmul %0, %12, %cst_11 {dimension_numbers = #tpu.dot_dimension_numbers<[1], [0], [0], [1], [0, 0, 1, 1], [], []>} : vector<8x64xf32>, vector<64x256xf32>, vector<8x256xf32> -> vector<8x256xf32>
    %14 = arith.addf %11, %13 : vector<8x256xf32>
    %15 = vector.extract_strided_slice %14 {offsets = [0, 0], sizes = [8, 192], strides = [1, 1]} : vector<8x256xf32> to vector<8x192xf32>
    %16 = arith.negf %15 : vector<8x192xf32>
    %17 = math.exp %16 : vector<8x192xf32>
    %cst_12 = arith.constant 1.000000e+00 : f32
    %18 = vector.broadcast %cst_12 : f32 to vector<8x192xf32>
    %19 = arith.addf %18, %17 : vector<8x192xf32>
    %20 = arith.divf %18, %19 : vector<8x192xf32>
    %21 = vector.extract_strided_slice %14 {offsets = [0, 192], sizes = [8, 64], strides = [1, 1]} : vector<8x256xf32> to vector<8x64xf32>
    %22 = math.tanh %21 : vector<8x64xf32>
    %23 = vector.extract_strided_slice %20 {offsets = [0, 64], sizes = [8, 64], strides = [1, 1]} : vector<8x192xf32> to vector<8x64xf32>
    %24 = arith.mulf %23, %0 : vector<8x64xf32>
    %25 = vector.extract_strided_slice %20 {offsets = [0, 0], sizes = [8, 64], strides = [1, 1]} : vector<8x192xf32> to vector<8x64xf32>
    %26 = arith.mulf %25, %22 : vector<8x64xf32>
    %27 = arith.addf %24, %26 : vector<8x64xf32>
    %28 = vector.extract_strided_slice %20 {offsets = [0, 128], sizes = [8, 64], strides = [1, 1]} : vector<8x192xf32> to vector<8x64xf32>
    %29 = math.tanh %27 : vector<8x64xf32>
    %30 = arith.mulf %28, %29 : vector<8x64xf32>
    %31 = arith.index_cast %9 : i32 to index
    %c0_13 = arith.constant 0 : index
    %32 = vector.load %arg14[%31, %c0_13] : memref<64x64xf32, #tpu.memory_space<vmem>>, vector<8x64xf32>
    tpu.vector_store %arg14[%31, %c0_13], %30 {strides = array<i32>} : memref<64x64xf32, #tpu.memory_space<vmem>>, vector<8x64xf32>,
    %c1_i32 = arith.constant 1 : i32
    %c8_i32_14 = arith.constant 8 : i32
    %33 = arith.muli %c1_i32, %c8_i32_14 : i32
    %34 = tpu.assume_multiple %33, 8 : i32
    %35 = arith.index_cast %34 : i32 to index
    %c0_15 = arith.constant 0 : index
    %36 = vector.load %arg13[%35, %c0_15] : memref<64x256xf32, #tpu.memory_space<vmem>>, vector<8x256xf32>
    %c0_16 = arith.constant 0 : index
    %c0_17 = arith.constant 0 : index
    %37 = vector.load %arg3[%c0_16, %c0_17] : memref<64x256xf32, #tpu.memory_space<vmem>>, vector<64x256xf32>
    %cst_18 = arith.constant dense<0.000000e+00> : vector<8x256xf32>
    %38 = tpu.matmul %30, %37, %cst_18 {dimension_numbers = #tpu.dot_dimension_numbers<[1], [0], [0], [1], [0, 0, 1, 1], [], []>} : vector<8x64xf32>, vector<64x256xf32>, vector<8x256xf32> -> vector<8x256xf32>
    %39 = arith.addf %36, %38 : vector<8x256xf32>
    %40 = vector.extract_strided_slice %39 {offsets = [0, 0], sizes = [8, 192], strides = [1, 1]} : vector<8x256xf32> to vector<8x192xf32>
    %41 = arith.negf %40 : vector<8x192xf32>
    %42 = math.exp %41 : vector<8x192xf32>
    %cst_19 = arith.constant 1.000000e+00 : f32
    %43 = vector.broadcast %cst_19 : f32 to vector<8x192xf32>
    %44 = arith.addf %43, %42 : vector<8x192xf32>
    %45 = arith.divf %43, %44 : vector<8x192xf32>
    %46 = vector.extract_strided_slice %39 {offsets = [0, 192], sizes = [8, 64], strides = [1, 1]} : vector<8x256xf32> to vector<8x64xf32>
    %47 = math.tanh %46 : vector<8x64xf32>
    %48 = vector.extract_strided_slice %45 {offsets = [0, 64], sizes = [8, 64], strides = [1, 1]} : vector<8x192xf32> to vector<8x64xf32>
    %49 = arith.mulf %48, %27 : vector<8x64xf32>
    %50 = vector.extract_strided_slice %45 {offsets = [0, 0], sizes = [8, 64], strides = [1, 1]} : vector<8x192xf32> to vector<8x64xf32>
    %51 = arith.mulf %50, %47 : vector<8x64xf32>
    %52 = arith.addf %49, %51 : vector<8x64xf32>
    %53 = vector.extract_strided_slice %45 {offsets = [0, 128], sizes = [8, 64], strides = [1, 1]} : vector<8x192xf32> to vector<8x64xf32>
    %54 = math.tanh %52 : vector<8x64xf32>
    %55 = arith.mulf %53, %54 : vector<8x64xf32>
    %56 = arith.index_cast %34 : i32 to index
    %c0_20 = arith.constant 0 : index
    %57 = vector.load %arg14[%56, %c0_20] : memref<64x64xf32, #tpu.memory_space<vmem>>, vector<8x64xf32>
    tpu.vector_store %arg14[%56, %c0_20], %55 {strides = array<i32>} : memref<64x64xf32, #tpu.memory_space<vmem>>, vector<8x64xf32>,
    %c2_i32 = arith.constant 2 : i32
    %c8_i32_21 = arith.constant 8 : i32
    %58 = arith.muli %c2_i32, %c8_i32_21 : i32
    %59 = tpu.assume_multiple %58, 8 : i32
    %60 = arith.index_cast %59 : i32 to index
    %c0_22 = arith.constant 0 : index
    %61 = vector.load %arg13[%60, %c0_22] : memref<64x256xf32, #tpu.memory_space<vmem>>, vector<8x256xf32>
    %c0_23 = arith.constant 0 : index
    %c0_24 = arith.constant 0 : index
    %62 = vector.load %arg3[%c0_23, %c0_24] : memref<64x256xf32, #tpu.memory_space<vmem>>, vector<64x256xf32>
    %cst_25 = arith.constant dense<0.000000e+00> : vector<8x256xf32>
    %63 = tpu.matmul %55, %62, %cst_25 {dimension_numbers = #tpu.dot_dimension_numbers<[1], [0], [0], [1], [0, 0, 1, 1], [], []>} : vector<8x64xf32>, vector<64x256xf32>, vector<8x256xf32> -> vector<8x256xf32>
    %64 = arith.addf %61, %63 : vector<8x256xf32>
    %65 = vector.extract_strided_slice %64 {offsets = [0, 0], sizes = [8, 192], strides = [1, 1]} : vector<8x256xf32> to vector<8x192xf32>
    %66 = arith.negf %65 : vector<8x192xf32>
    %67 = math.exp %66 : vector<8x192xf32>
    %cst_26 = arith.constant 1.000000e+00 : f32
    %68 = vector.broadcast %cst_26 : f32 to vector<8x192xf32>
    %69 = arith.addf %68, %67 : vector<8x192xf32>
    %70 = arith.divf %68, %69 : vector<8x192xf32>
    %71 = vector.extract_strided_slice %64 {offsets = [0, 192], sizes = [8, 64], strides = [1, 1]} : vector<8x256xf32> to vector<8x64xf32>
    %72 = math.tanh %71 : vector<8x64xf32>
    %73 = vector.extract_strided_slice %70 {offsets = [0, 64], sizes = [8, 64], strides = [1, 1]} : vector<8x192xf32> to vector<8x64xf32>
    %74 = arith.mulf %73, %52 : vector<8x64xf32>
    %75 = vector.extract_strided_slice %70 {offsets = [0, 0], sizes = [8, 64], strides = [1, 1]} : vector<8x192xf32> to vector<8x64xf32>
    %76 = arith.mulf %75, %72 : vector<8x64xf32>
    %77 = arith.addf %74, %76 : vector<8x64xf32>
    %78 = vector.extract_strided_slice %70 {offsets = [0, 128], sizes = [8, 64], strides = [1, 1]} : vector<8x192xf32> to vector<8x64xf32>
    %79 = math.tanh %77 : vector<8x64xf32>
    %80 = arith.mulf %78, %79 : vector<8x64xf32>
    %81 = arith.index_cast %59 : i32 to index
    %c0_27 = arith.constant 0 : index
    %82 = vector.load %arg14[%81, %c0_27] : memref<64x64xf32, #tpu.memory_space<vmem>>, vector<8x64xf32>
    tpu.vector_store %arg14[%81, %c0_27], %80 {strides = array<i32>} : memref<64x64xf32, #tpu.memory_space<vmem>>, vector<8x64xf32>,
    %c3_i32 = arith.constant 3 : i32
    %c8_i32_28 = arith.constant 8 : i32
    %83 = arith.muli %c3_i32, %c8_i32_28 : i32
    %84 = tpu.assume_multiple %83, 8 : i32
    %85 = arith.index_cast %84 : i32 to index
    %c0_29 = arith.constant 0 : index
    %86 = vector.load %arg13[%85, %c0_29] : memref<64x256xf32, #tpu.memory_space<vmem>>, vector<8x256xf32>
    %c0_30 = arith.constant 0 : index
    %c0_31 = arith.constant 0 : index
    %87 = vector.load %arg3[%c0_30, %c0_31] : memref<64x256xf32, #tpu.memory_space<vmem>>, vector<64x256xf32>
    %cst_32 = arith.constant dense<0.000000e+00> : vector<8x256xf32>
    %88 = tpu.matmul %80, %87, %cst_32 {dimension_numbers = #tpu.dot_dimension_numbers<[1], [0], [0], [1], [0, 0, 1, 1], [], []>} : vector<8x64xf32>, vector<64x256xf32>, vector<8x256xf32> -> vector<8x256xf32>
    %89 = arith.addf %86, %88 : vector<8x256xf32>
    %90 = vector.extract_strided_slice %89 {offsets = [0, 0], sizes = [8, 192], strides = [1, 1]} : vector<8x256xf32> to vector<8x192xf32>
    %91 = arith.negf %90 : vector<8x192xf32>
    %92 = math.exp %91 : vector<8x192xf32>
    %cst_33 = arith.constant 1.000000e+00 : f32
    %93 = vector.broadcast %cst_33 : f32 to vector<8x192xf32>
    %94 = arith.addf %93, %92 : vector<8x192xf32>
    %95 = arith.divf %93, %94 : vector<8x192xf32>
    %96 = vector.extract_strided_slice %89 {offsets = [0, 192], sizes = [8, 64], strides = [1, 1]} : vector<8x256xf32> to vector<8x64xf32>
    %97 = math.tanh %96 : vector<8x64xf32>
    %98 = vector.extract_strided_slice %95 {offsets = [0, 64], sizes = [8, 64], strides = [1, 1]} : vector<8x192xf32> to vector<8x64xf32>
    %99 = arith.mulf %98, %77 : vector<8x64xf32>
    %100 = vector.extract_strided_slice %95 {offsets = [0, 0], sizes = [8, 64], strides = [1, 1]} : vector<8x192xf32> to vector<8x64xf32>
    %101 = arith.mulf %100, %97 : vector<8x64xf32>
    %102 = arith.addf %99, %101 : vector<8x64xf32>
    %103 = vector.extract_strided_slice %95 {offsets = [0, 128], sizes = [8, 64], strides = [1, 1]} : vector<8x192xf32> to vector<8x64xf32>
    %104 = math.tanh %102 : vector<8x64xf32>
    %105 = arith.mulf %103, %104 : vector<8x64xf32>
    %106 = arith.index_cast %84 : i32 to index
    %c0_34 = arith.constant 0 : index
    %107 = vector.load %arg14[%106, %c0_34] : memref<64x64xf32, #tpu.memory_space<vmem>>, vector<8x64xf32>
    tpu.vector_store %arg14[%106, %c0_34], %105 {strides = array<i32>} : memref<64x64xf32, #tpu.memory_space<vmem>>, vector<8x64xf32>,
    %c4_i32 = arith.constant 4 : i32
    %c8_i32_35 = arith.constant 8 : i32
    %108 = arith.muli %c4_i32, %c8_i32_35 : i32
    %109 = tpu.assume_multiple %108, 8 : i32
    %110 = arith.index_cast %109 : i32 to index
    %c0_36 = arith.constant 0 : index
    %111 = vector.load %arg13[%110, %c0_36] : memref<64x256xf32, #tpu.memory_space<vmem>>, vector<8x256xf32>
    %c0_37 = arith.constant 0 : index
    %c0_38 = arith.constant 0 : index
    %112 = vector.load %arg3[%c0_37, %c0_38] : memref<64x256xf32, #tpu.memory_space<vmem>>, vector<64x256xf32>
    %cst_39 = arith.constant dense<0.000000e+00> : vector<8x256xf32>
    %113 = tpu.matmul %105, %112, %cst_39 {dimension_numbers = #tpu.dot_dimension_numbers<[1], [0], [0], [1], [0, 0, 1, 1], [], []>} : vector<8x64xf32>, vector<64x256xf32>, vector<8x256xf32> -> vector<8x256xf32>
    %114 = arith.addf %111, %113 : vector<8x256xf32>
    %115 = vector.extract_strided_slice %114 {offsets = [0, 0], sizes = [8, 192], strides = [1, 1]} : vector<8x256xf32> to vector<8x192xf32>
    %116 = arith.negf %115 : vector<8x192xf32>
    %117 = math.exp %116 : vector<8x192xf32>
    %cst_40 = arith.constant 1.000000e+00 : f32
    %118 = vector.broadcast %cst_40 : f32 to vector<8x192xf32>
    %119 = arith.addf %118, %117 : vector<8x192xf32>
    %120 = arith.divf %118, %119 : vector<8x192xf32>
    %121 = vector.extract_strided_slice %114 {offsets = [0, 192], sizes = [8, 64], strides = [1, 1]} : vector<8x256xf32> to vector<8x64xf32>
    %122 = math.tanh %121 : vector<8x64xf32>
    %123 = vector.extract_strided_slice %120 {offsets = [0, 64], sizes = [8, 64], strides = [1, 1]} : vector<8x192xf32> to vector<8x64xf32>
    %124 = arith.mulf %123, %102 : vector<8x64xf32>
    %125 = vector.extract_strided_slice %120 {offsets = [0, 0], sizes = [8, 64], strides = [1, 1]} : vector<8x192xf32> to vector<8x64xf32>
    %126 = arith.mulf %125, %122 : vector<8x64xf32>
    %127 = arith.addf %124, %126 : vector<8x64xf32>
    %128 = vector.extract_strided_slice %120 {offsets = [0, 128], sizes = [8, 64], strides = [1, 1]} : vector<8x192xf32> to vector<8x64xf32>
    %129 = math.tanh %127 : vector<8x64xf32>
    %130 = arith.mulf %128, %129 : vector<8x64xf32>
    %131 = arith.index_cast %109 : i32 to index
    %c0_41 = arith.constant 0 : index
    %132 = vector.load %arg14[%131, %c0_41] : memref<64x64xf32, #tpu.memory_space<vmem>>, vector<8x64xf32>
    tpu.vector_store %arg14[%131, %c0_41], %130 {strides = array<i32>} : memref<64x64xf32, #tpu.memory_space<vmem>>, vector<8x64xf32>,
    %c5_i32 = arith.constant 5 : i32
    %c8_i32_42 = arith.constant 8 : i32
    %133 = arith.muli %c5_i32, %c8_i32_42 : i32
    %134 = tpu.assume_multiple %133, 8 : i32
    %135 = arith.index_cast %134 : i32 to index
    %c0_43 = arith.constant 0 : index
    %136 = vector.load %arg13[%135, %c0_43] : memref<64x256xf32, #tpu.memory_space<vmem>>, vector<8x256xf32>
    %c0_44 = arith.constant 0 : index
    %c0_45 = arith.constant 0 : index
    %137 = vector.load %arg3[%c0_44, %c0_45] : memref<64x256xf32, #tpu.memory_space<vmem>>, vector<64x256xf32>
    %cst_46 = arith.constant dense<0.000000e+00> : vector<8x256xf32>
    %138 = tpu.matmul %130, %137, %cst_46 {dimension_numbers = #tpu.dot_dimension_numbers<[1], [0], [0], [1], [0, 0, 1, 1], [], []>} : vector<8x64xf32>, vector<64x256xf32>, vector<8x256xf32> -> vector<8x256xf32>
    %139 = arith.addf %136, %138 : vector<8x256xf32>
    %140 = vector.extract_strided_slice %139 {offsets = [0, 0], sizes = [8, 192], strides = [1, 1]} : vector<8x256xf32> to vector<8x192xf32>
    %141 = arith.negf %140 : vector<8x192xf32>
    %142 = math.exp %141 : vector<8x192xf32>
    %cst_47 = arith.constant 1.000000e+00 : f32
    %143 = vector.broadcast %cst_47 : f32 to vector<8x192xf32>
    %144 = arith.addf %143, %142 : vector<8x192xf32>
    %145 = arith.divf %143, %144 : vector<8x192xf32>
    %146 = vector.extract_strided_slice %139 {offsets = [0, 192], sizes = [8, 64], strides = [1, 1]} : vector<8x256xf32> to vector<8x64xf32>
    %147 = math.tanh %146 : vector<8x64xf32>
    %148 = vector.extract_strided_slice %145 {offsets = [0, 64], sizes = [8, 64], strides = [1, 1]} : vector<8x192xf32> to vector<8x64xf32>
    %149 = arith.mulf %148, %127 : vector<8x64xf32>
    %150 = vector.extract_strided_slice %145 {offsets = [0, 0], sizes = [8, 64], strides = [1, 1]} : vector<8x192xf32> to vector<8x64xf32>
    %151 = arith.mulf %150, %147 : vector<8x64xf32>
    %152 = arith.addf %149, %151 : vector<8x64xf32>
    %153 = vector.extract_strided_slice %145 {offsets = [0, 128], sizes = [8, 64], strides = [1, 1]} : vector<8x192xf32> to vector<8x64xf32>
    %154 = math.tanh %152 : vector<8x64xf32>
    %155 = arith.mulf %153, %154 : vector<8x64xf32>
    %156 = arith.index_cast %134 : i32 to index
    %c0_48 = arith.constant 0 : index
    %157 = vector.load %arg14[%156, %c0_48] : memref<64x64xf32, #tpu.memory_space<vmem>>, vector<8x64xf32>
    tpu.vector_store %arg14[%156, %c0_48], %155 {strides = array<i32>} : memref<64x64xf32, #tpu.memory_space<vmem>>, vector<8x64xf32>,
    %c6_i32 = arith.constant 6 : i32
    %c8_i32_49 = arith.constant 8 : i32
    %158 = arith.muli %c6_i32, %c8_i32_49 : i32
    %159 = tpu.assume_multiple %158, 8 : i32
    %160 = arith.index_cast %159 : i32 to index
    %c0_50 = arith.constant 0 : index
    %161 = vector.load %arg13[%160, %c0_50] : memref<64x256xf32, #tpu.memory_space<vmem>>, vector<8x256xf32>
    %c0_51 = arith.constant 0 : index
    %c0_52 = arith.constant 0 : index
    %162 = vector.load %arg3[%c0_51, %c0_52] : memref<64x256xf32, #tpu.memory_space<vmem>>, vector<64x256xf32>
    %cst_53 = arith.constant dense<0.000000e+00> : vector<8x256xf32>
    %163 = tpu.matmul %155, %162, %cst_53 {dimension_numbers = #tpu.dot_dimension_numbers<[1], [0], [0], [1], [0, 0, 1, 1], [], []>} : vector<8x64xf32>, vector<64x256xf32>, vector<8x256xf32> -> vector<8x256xf32>
    %164 = arith.addf %161, %163 : vector<8x256xf32>
    %165 = vector.extract_strided_slice %164 {offsets = [0, 0], sizes = [8, 192], strides = [1, 1]} : vector<8x256xf32> to vector<8x192xf32>
    %166 = arith.negf %165 : vector<8x192xf32>
    %167 = math.exp %166 : vector<8x192xf32>
    %cst_54 = arith.constant 1.000000e+00 : f32
    %168 = vector.broadcast %cst_54 : f32 to vector<8x192xf32>
    %169 = arith.addf %168, %167 : vector<8x192xf32>
    %170 = arith.divf %168, %169 : vector<8x192xf32>
    %171 = vector.extract_strided_slice %164 {offsets = [0, 192], sizes = [8, 64], strides = [1, 1]} : vector<8x256xf32> to vector<8x64xf32>
    %172 = math.tanh %171 : vector<8x64xf32>
    %173 = vector.extract_strided_slice %170 {offsets = [0, 64], sizes = [8, 64], strides = [1, 1]} : vector<8x192xf32> to vector<8x64xf32>
    %174 = arith.mulf %173, %152 : vector<8x64xf32>
    %175 = vector.extract_strided_slice %170 {offsets = [0, 0], sizes = [8, 64], strides = [1, 1]} : vector<8x192xf32> to vector<8x64xf32>
    %176 = arith.mulf %175, %172 : vector<8x64xf32>
    %177 = arith.addf %174, %176 : vector<8x64xf32>
    %178 = vector.extract_strided_slice %170 {offsets = [0, 128], sizes = [8, 64], strides = [1, 1]} : vector<8x192xf32> to vector<8x64xf32>
    %179 = math.tanh %177 : vector<8x64xf32>
    %180 = arith.mulf %178, %179 : vector<8x64xf32>
    %181 = arith.index_cast %159 : i32 to index
    %c0_55 = arith.constant 0 : index
    %182 = vector.load %arg14[%181, %c0_55] : memref<64x64xf32, #tpu.memory_space<vmem>>, vector<8x64xf32>
    tpu.vector_store %arg14[%181, %c0_55], %180 {strides = array<i32>} : memref<64x64xf32, #tpu.memory_space<vmem>>, vector<8x64xf32>,
    %c7_i32 = arith.constant 7 : i32
    %c8_i32_56 = arith.constant 8 : i32
    %183 = arith.muli %c7_i32, %c8_i32_56 : i32
    %184 = tpu.assume_multiple %183, 8 : i32
    %185 = arith.index_cast %184 : i32 to index
    %c0_57 = arith.constant 0 : index
    %186 = vector.load %arg13[%185, %c0_57] : memref<64x256xf32, #tpu.memory_space<vmem>>, vector<8x256xf32>
    %c0_58 = arith.constant 0 : index
    %c0_59 = arith.constant 0 : index
    %187 = vector.load %arg3[%c0_58, %c0_59] : memref<64x256xf32, #tpu.memory_space<vmem>>, vector<64x256xf32>
    %cst_60 = arith.constant dense<0.000000e+00> : vector<8x256xf32>
    %188 = tpu.matmul %180, %187, %cst_60 {dimension_numbers = #tpu.dot_dimension_numbers<[1], [0], [0], [1], [0, 0, 1, 1], [], []>} : vector<8x64xf32>, vector<64x256xf32>, vector<8x256xf32> -> vector<8x256xf32>
    %189 = arith.addf %186, %188 : vector<8x256xf32>
    %190 = vector.extract_strided_slice %189 {offsets = [0, 0], sizes = [8, 192], strides = [1, 1]} : vector<8x256xf32> to vector<8x192xf32>
    %191 = arith.negf %190 : vector<8x192xf32>
    %192 = math.exp %191 : vector<8x192xf32>
    %cst_61 = arith.constant 1.000000e+00 : f32
    %193 = vector.broadcast %cst_61 : f32 to vector<8x192xf32>
    %194 = arith.addf %193, %192 : vector<8x192xf32>
    %195 = arith.divf %193, %194 : vector<8x192xf32>
    %196 = vector.extract_strided_slice %189 {offsets = [0, 192], sizes = [8, 64], strides = [1, 1]} : vector<8x256xf32> to vector<8x64xf32>
    %197 = math.tanh %196 : vector<8x64xf32>
    %198 = vector.extract_strided_slice %195 {offsets = [0, 64], sizes = [8, 64], strides = [1, 1]} : vector<8x192xf32> to vector<8x64xf32>
    %199 = arith.mulf %198, %177 : vector<8x64xf32>
    %200 = vector.extract_strided_slice %195 {offsets = [0, 0], sizes = [8, 64], strides = [1, 1]} : vector<8x192xf32> to vector<8x64xf32>
    %201 = arith.mulf %200, %197 : vector<8x64xf32>
    %202 = arith.addf %199, %201 : vector<8x64xf32>
    %203 = vector.extract_strided_slice %195 {offsets = [0, 128], sizes = [8, 64], strides = [1, 1]} : vector<8x192xf32> to vector<8x64xf32>
    %204 = math.tanh %202 : vector<8x64xf32>
    %205 = arith.mulf %203, %204 : vector<8x64xf32>
    %206 = arith.index_cast %184 : i32 to index
    %c0_62 = arith.constant 0 : index
    %207 = vector.load %arg14[%206, %c0_62] : memref<64x64xf32, #tpu.memory_space<vmem>>, vector<8x64xf32>
    tpu.vector_store %arg14[%206, %c0_62], %205 {strides = array<i32>} : memref<64x64xf32, #tpu.memory_space<vmem>>, vector<8x64xf32>,
    %c8_i32_63 = arith.constant 8 : i32
    %c0_64 = arith.constant 0 : index
    %c0_65 = arith.constant 0 : index
    %208 = vector.load %arg14[%c0_64, %c0_65] : memref<64x64xf32, #tpu.memory_space<vmem>>, vector<64x64xf32>
    %c0_66 = arith.constant 0 : index
    %c0_67 = arith.constant 0 : index
    %209 = vector.load %arg5[%c0_66, %c0_67] : memref<64x256xf32, #tpu.memory_space<vmem>>, vector<64x256xf32>
    %cst_68 = arith.constant dense<0.000000e+00> : vector<64x256xf32>
    %210 = tpu.matmul %208, %209, %cst_68 {dimension_numbers = #tpu.dot_dimension_numbers<[1], [0], [0], [1], [0, 0, 1, 1], [], []>} : vector<64x64xf32>, vector<64x256xf32>, vector<64x256xf32> -> vector<64x256xf32>
    %c0_69 = arith.constant 0 : index
    %c0_70 = arith.constant 0 : index
    %211 = vector.load %arg7[%c0_69, %c0_70] : memref<1x256xf32, #tpu.memory_space<vmem>>, vector<1x256xf32>
    %212 = vector.broadcast %211 : vector<1x256xf32> to vector<64x256xf32>
    %213 = arith.addf %210, %212 : vector<64x256xf32>
    %c0_71 = arith.constant 0 : index
    %c0_72 = arith.constant 0 : index
    %214 = vector.load %arg13[%c0_71, %c0_72] : memref<64x256xf32, #tpu.memory_space<vmem>>, vector<64x256xf32>
    tpu.vector_store %arg13[%c0_71, %c0_72], %213 {strides = array<i32>} : memref<64x256xf32, #tpu.memory_space<vmem>>, vector<64x256xf32>,
    %c0_i32_73 = arith.constant 0 : i32
    %c8_i32_74 = arith.constant 8 : i32
    %215 = arith.muli %c0_i32_73, %c8_i32_74 : i32
    %216 = tpu.assume_multiple %215, 8 : i32
    %217 = arith.index_cast %216 : i32 to index
    %c0_75 = arith.constant 0 : index
    %218 = vector.load %arg13[%217, %c0_75] : memref<64x256xf32, #tpu.memory_space<vmem>>, vector<8x256xf32>
    %c0_76 = arith.constant 0 : index
    %c0_77 = arith.constant 0 : index
    %219 = vector.load %arg6[%c0_76, %c0_77] : memref<64x256xf32, #tpu.memory_space<vmem>>, vector<64x256xf32>
    %cst_78 = arith.constant dense<0.000000e+00> : vector<8x256xf32>
    %220 = tpu.matmul %0, %219, %cst_78 {dimension_numbers = #tpu.dot_dimension_numbers<[1], [0], [0], [1], [0, 0, 1, 1], [], []>} : vector<8x64xf32>, vector<64x256xf32>, vector<8x256xf32> -> vector<8x256xf32>
    %221 = arith.addf %218, %220 : vector<8x256xf32>
    %222 = vector.extract_strided_slice %221 {offsets = [0, 0], sizes = [8, 192], strides = [1, 1]} : vector<8x256xf32> to vector<8x192xf32>
    %223 = arith.negf %222 : vector<8x192xf32>
    %224 = math.exp %223 : vector<8x192xf32>
    %cst_79 = arith.constant 1.000000e+00 : f32
    %225 = vector.broadcast %cst_79 : f32 to vector<8x192xf32>
    %226 = arith.addf %225, %224 : vector<8x192xf32>
    %227 = arith.divf %225, %226 : vector<8x192xf32>
    %228 = vector.extract_strided_slice %221 {offsets = [0, 192], sizes = [8, 64], strides = [1, 1]} : vector<8x256xf32> to vector<8x64xf32>
    %229 = math.tanh %228 : vector<8x64xf32>
    %230 = vector.extract_strided_slice %227 {offsets = [0, 64], sizes = [8, 64], strides = [1, 1]} : vector<8x192xf32> to vector<8x64xf32>
    %231 = arith.mulf %230, %0 : vector<8x64xf32>
    %232 = vector.extract_strided_slice %227 {offsets = [0, 0], sizes = [8, 64], strides = [1, 1]} : vector<8x192xf32> to vector<8x64xf32>
    %233 = arith.mulf %232, %229 : vector<8x64xf32>
    %234 = arith.addf %231, %233 : vector<8x64xf32>
    %235 = vector.extract_strided_slice %227 {offsets = [0, 128], sizes = [8, 64], strides = [1, 1]} : vector<8x192xf32> to vector<8x64xf32>
    %236 = math.tanh %234 : vector<8x64xf32>
    %237 = arith.mulf %235, %236 : vector<8x64xf32>
    %c1_i32_80 = arith.constant 1 : i32
    %c8_i32_81 = arith.constant 8 : i32
    %238 = arith.muli %c1_i32_80, %c8_i32_81 : i32
    %239 = tpu.assume_multiple %238, 8 : i32
    %240 = arith.index_cast %239 : i32 to index
    %c0_82 = arith.constant 0 : index
    %241 = vector.load %arg13[%240, %c0_82] : memref<64x256xf32, #tpu.memory_space<vmem>>, vector<8x256xf32>
    %c0_83 = arith.constant 0 : index
    %c0_84 = arith.constant 0 : index
    %242 = vector.load %arg6[%c0_83, %c0_84] : memref<64x256xf32, #tpu.memory_space<vmem>>, vector<64x256xf32>
    %cst_85 = arith.constant dense<0.000000e+00> : vector<8x256xf32>
    %243 = tpu.matmul %237, %242, %cst_85 {dimension_numbers = #tpu.dot_dimension_numbers<[1], [0], [0], [1], [0, 0, 1, 1], [], []>} : vector<8x64xf32>, vector<64x256xf32>, vector<8x256xf32> -> vector<8x256xf32>
    %244 = arith.addf %241, %243 : vector<8x256xf32>
    %245 = vector.extract_strided_slice %244 {offsets = [0, 0], sizes = [8, 192], strides = [1, 1]} : vector<8x256xf32> to vector<8x192xf32>
    %246 = arith.negf %245 : vector<8x192xf32>
    %247 = math.exp %246 : vector<8x192xf32>
    %cst_86 = arith.constant 1.000000e+00 : f32
    %248 = vector.broadcast %cst_86 : f32 to vector<8x192xf32>
    %249 = arith.addf %248, %247 : vector<8x192xf32>
    %250 = arith.divf %248, %249 : vector<8x192xf32>
    %251 = vector.extract_strided_slice %244 {offsets = [0, 192], sizes = [8, 64], strides = [1, 1]} : vector<8x256xf32> to vector<8x64xf32>
    %252 = math.tanh %251 : vector<8x64xf32>
    %253 = vector.extract_strided_slice %250 {offsets = [0, 64], sizes = [8, 64], strides = [1, 1]} : vector<8x192xf32> to vector<8x64xf32>
    %254 = arith.mulf %253, %234 : vector<8x64xf32>
    %255 = vector.extract_strided_slice %250 {offsets = [0, 0], sizes = [8, 64], strides = [1, 1]} : vector<8x192xf32> to vector<8x64xf32>
    %256 = arith.mulf %255, %252 : vector<8x64xf32>
    %257 = arith.addf %254, %256 : vector<8x64xf32>
    %258 = vector.extract_strided_slice %250 {offsets = [0, 128], sizes = [8, 64], strides = [1, 1]} : vector<8x192xf32> to vector<8x64xf32>
    %259 = math.tanh %257 : vector<8x64xf32>
    %260 = arith.mulf %258, %259 : vector<8x64xf32>
    %c2_i32_87 = arith.constant 2 : i32
    %c8_i32_88 = arith.constant 8 : i32
    %261 = arith.muli %c2_i32_87, %c8_i32_88 : i32
    %262 = tpu.assume_multiple %261, 8 : i32
    %263 = arith.index_cast %262 : i32 to index
    %c0_89 = arith.constant 0 : index
    %264 = vector.load %arg13[%263, %c0_89] : memref<64x256xf32, #tpu.memory_space<vmem>>, vector<8x256xf32>
    %c0_90 = arith.constant 0 : index
    %c0_91 = arith.constant 0 : index
    %265 = vector.load %arg6[%c0_90, %c0_91] : memref<64x256xf32, #tpu.memory_space<vmem>>, vector<64x256xf32>
    %cst_92 = arith.constant dense<0.000000e+00> : vector<8x256xf32>
    %266 = tpu.matmul %260, %265, %cst_92 {dimension_numbers = #tpu.dot_dimension_numbers<[1], [0], [0], [1], [0, 0, 1, 1], [], []>} : vector<8x64xf32>, vector<64x256xf32>, vector<8x256xf32> -> vector<8x256xf32>
    %267 = arith.addf %264, %266 : vector<8x256xf32>
    %268 = vector.extract_strided_slice %267 {offsets = [0, 0], sizes = [8, 192], strides = [1, 1]} : vector<8x256xf32> to vector<8x192xf32>
    %269 = arith.negf %268 : vector<8x192xf32>
    %270 = math.exp %269 : vector<8x192xf32>
    %cst_93 = arith.constant 1.000000e+00 : f32
    %271 = vector.broadcast %cst_93 : f32 to vector<8x192xf32>
    %272 = arith.addf %271, %270 : vector<8x192xf32>
    %273 = arith.divf %271, %272 : vector<8x192xf32>
    %274 = vector.extract_strided_slice %267 {offsets = [0, 192], sizes = [8, 64], strides = [1, 1]} : vector<8x256xf32> to vector<8x64xf32>
    %275 = math.tanh %274 : vector<8x64xf32>
    %276 = vector.extract_strided_slice %273 {offsets = [0, 64], sizes = [8, 64], strides = [1, 1]} : vector<8x192xf32> to vector<8x64xf32>
    %277 = arith.mulf %276, %257 : vector<8x64xf32>
    %278 = vector.extract_strided_slice %273 {offsets = [0, 0], sizes = [8, 64], strides = [1, 1]} : vector<8x192xf32> to vector<8x64xf32>
    %279 = arith.mulf %278, %275 : vector<8x64xf32>
    %280 = arith.addf %277, %279 : vector<8x64xf32>
    %281 = vector.extract_strided_slice %273 {offsets = [0, 128], sizes = [8, 64], strides = [1, 1]} : vector<8x192xf32> to vector<8x64xf32>
    %282 = math.tanh %280 : vector<8x64xf32>
    %283 = arith.mulf %281, %282 : vector<8x64xf32>
    %c3_i32_94 = arith.constant 3 : i32
    %c8_i32_95 = arith.constant 8 : i32
    %284 = arith.muli %c3_i32_94, %c8_i32_95 : i32
    %285 = tpu.assume_multiple %284, 8 : i32
    %286 = arith.index_cast %285 : i32 to index
    %c0_96 = arith.constant 0 : index
    %287 = vector.load %arg13[%286, %c0_96] : memref<64x256xf32, #tpu.memory_space<vmem>>, vector<8x256xf32>
    %c0_97 = arith.constant 0 : index
    %c0_98 = arith.constant 0 : index
    %288 = vector.load %arg6[%c0_97, %c0_98] : memref<64x256xf32, #tpu.memory_space<vmem>>, vector<64x256xf32>
    %cst_99 = arith.constant dense<0.000000e+00> : vector<8x256xf32>
    %289 = tpu.matmul %283, %288, %cst_99 {dimension_numbers = #tpu.dot_dimension_numbers<[1], [0], [0], [1], [0, 0, 1, 1], [], []>} : vector<8x64xf32>, vector<64x256xf32>, vector<8x256xf32> -> vector<8x256xf32>
    %290 = arith.addf %287, %289 : vector<8x256xf32>
    %291 = vector.extract_strided_slice %290 {offsets = [0, 0], sizes = [8, 192], strides = [1, 1]} : vector<8x256xf32> to vector<8x192xf32>
    %292 = arith.negf %291 : vector<8x192xf32>
    %293 = math.exp %292 : vector<8x192xf32>
    %cst_100 = arith.constant 1.000000e+00 : f32
    %294 = vector.broadcast %cst_100 : f32 to vector<8x192xf32>
    %295 = arith.addf %294, %293 : vector<8x192xf32>
    %296 = arith.divf %294, %295 : vector<8x192xf32>
    %297 = vector.extract_strided_slice %290 {offsets = [0, 192], sizes = [8, 64], strides = [1, 1]} : vector<8x256xf32> to vector<8x64xf32>
    %298 = math.tanh %297 : vector<8x64xf32>
    %299 = vector.extract_strided_slice %296 {offsets = [0, 64], sizes = [8, 64], strides = [1, 1]} : vector<8x192xf32> to vector<8x64xf32>
    %300 = arith.mulf %299, %280 : vector<8x64xf32>
    %301 = vector.extract_strided_slice %296 {offsets = [0, 0], sizes = [8, 64], strides = [1, 1]} : vector<8x192xf32> to vector<8x64xf32>
    %302 = arith.mulf %301, %298 : vector<8x64xf32>
    %303 = arith.addf %300, %302 : vector<8x64xf32>
    %304 = vector.extract_strided_slice %296 {offsets = [0, 128], sizes = [8, 64], strides = [1, 1]} : vector<8x192xf32> to vector<8x64xf32>
    %305 = math.tanh %303 : vector<8x64xf32>
    %306 = arith.mulf %304, %305 : vector<8x64xf32>
    %c4_i32_101 = arith.constant 4 : i32
    %c8_i32_102 = arith.constant 8 : i32
    %307 = arith.muli %c4_i32_101, %c8_i32_102 : i32
    %308 = tpu.assume_multiple %307, 8 : i32
    %309 = arith.index_cast %308 : i32 to index
    %c0_103 = arith.constant 0 : index
    %310 = vector.load %arg13[%309, %c0_103] : memref<64x256xf32, #tpu.memory_space<vmem>>, vector<8x256xf32>
    %c0_104 = arith.constant 0 : index
    %c0_105 = arith.constant 0 : index
    %311 = vector.load %arg6[%c0_104, %c0_105] : memref<64x256xf32, #tpu.memory_space<vmem>>, vector<64x256xf32>
    %cst_106 = arith.constant dense<0.000000e+00> : vector<8x256xf32>
    %312 = tpu.matmul %306, %311, %cst_106 {dimension_numbers = #tpu.dot_dimension_numbers<[1], [0], [0], [1], [0, 0, 1, 1], [], []>} : vector<8x64xf32>, vector<64x256xf32>, vector<8x256xf32> -> vector<8x256xf32>
    %313 = arith.addf %310, %312 : vector<8x256xf32>
    %314 = vector.extract_strided_slice %313 {offsets = [0, 0], sizes = [8, 192], strides = [1, 1]} : vector<8x256xf32> to vector<8x192xf32>
    %315 = arith.negf %314 : vector<8x192xf32>
    %316 = math.exp %315 : vector<8x192xf32>
    %cst_107 = arith.constant 1.000000e+00 : f32
    %317 = vector.broadcast %cst_107 : f32 to vector<8x192xf32>
    %318 = arith.addf %317, %316 : vector<8x192xf32>
    %319 = arith.divf %317, %318 : vector<8x192xf32>
    %320 = vector.extract_strided_slice %313 {offsets = [0, 192], sizes = [8, 64], strides = [1, 1]} : vector<8x256xf32> to vector<8x64xf32>
    %321 = math.tanh %320 : vector<8x64xf32>
    %322 = vector.extract_strided_slice %319 {offsets = [0, 64], sizes = [8, 64], strides = [1, 1]} : vector<8x192xf32> to vector<8x64xf32>
    %323 = arith.mulf %322, %303 : vector<8x64xf32>
    %324 = vector.extract_strided_slice %319 {offsets = [0, 0], sizes = [8, 64], strides = [1, 1]} : vector<8x192xf32> to vector<8x64xf32>
    %325 = arith.mulf %324, %321 : vector<8x64xf32>
    %326 = arith.addf %323, %325 : vector<8x64xf32>
    %327 = vector.extract_strided_slice %319 {offsets = [0, 128], sizes = [8, 64], strides = [1, 1]} : vector<8x192xf32> to vector<8x64xf32>
    %328 = math.tanh %326 : vector<8x64xf32>
    %329 = arith.mulf %327, %328 : vector<8x64xf32>
    %c5_i32_108 = arith.constant 5 : i32
    %c8_i32_109 = arith.constant 8 : i32
    %330 = arith.muli %c5_i32_108, %c8_i32_109 : i32
    %331 = tpu.assume_multiple %330, 8 : i32
    %332 = arith.index_cast %331 : i32 to index
    %c0_110 = arith.constant 0 : index
    %333 = vector.load %arg13[%332, %c0_110] : memref<64x256xf32, #tpu.memory_space<vmem>>, vector<8x256xf32>
    %c0_111 = arith.constant 0 : index
    %c0_112 = arith.constant 0 : index
    %334 = vector.load %arg6[%c0_111, %c0_112] : memref<64x256xf32, #tpu.memory_space<vmem>>, vector<64x256xf32>
    %cst_113 = arith.constant dense<0.000000e+00> : vector<8x256xf32>
    %335 = tpu.matmul %329, %334, %cst_113 {dimension_numbers = #tpu.dot_dimension_numbers<[1], [0], [0], [1], [0, 0, 1, 1], [], []>} : vector<8x64xf32>, vector<64x256xf32>, vector<8x256xf32> -> vector<8x256xf32>
    %336 = arith.addf %333, %335 : vector<8x256xf32>
    %337 = vector.extract_strided_slice %336 {offsets = [0, 0], sizes = [8, 192], strides = [1, 1]} : vector<8x256xf32> to vector<8x192xf32>
    %338 = arith.negf %337 : vector<8x192xf32>
    %339 = math.exp %338 : vector<8x192xf32>
    %cst_114 = arith.constant 1.000000e+00 : f32
    %340 = vector.broadcast %cst_114 : f32 to vector<8x192xf32>
    %341 = arith.addf %340, %339 : vector<8x192xf32>
    %342 = arith.divf %340, %341 : vector<8x192xf32>
    %343 = vector.extract_strided_slice %336 {offsets = [0, 192], sizes = [8, 64], strides = [1, 1]} : vector<8x256xf32> to vector<8x64xf32>
    %344 = math.tanh %343 : vector<8x64xf32>
    %345 = vector.extract_strided_slice %342 {offsets = [0, 64], sizes = [8, 64], strides = [1, 1]} : vector<8x192xf32> to vector<8x64xf32>
    %346 = arith.mulf %345, %326 : vector<8x64xf32>
    %347 = vector.extract_strided_slice %342 {offsets = [0, 0], sizes = [8, 64], strides = [1, 1]} : vector<8x192xf32> to vector<8x64xf32>
    %348 = arith.mulf %347, %344 : vector<8x64xf32>
    %349 = arith.addf %346, %348 : vector<8x64xf32>
    %350 = vector.extract_strided_slice %342 {offsets = [0, 128], sizes = [8, 64], strides = [1, 1]} : vector<8x192xf32> to vector<8x64xf32>
    %351 = math.tanh %349 : vector<8x64xf32>
    %352 = arith.mulf %350, %351 : vector<8x64xf32>
    %c6_i32_115 = arith.constant 6 : i32
    %c8_i32_116 = arith.constant 8 : i32
    %353 = arith.muli %c6_i32_115, %c8_i32_116 : i32
    %354 = tpu.assume_multiple %353, 8 : i32
    %355 = arith.index_cast %354 : i32 to index
    %c0_117 = arith.constant 0 : index
    %356 = vector.load %arg13[%355, %c0_117] : memref<64x256xf32, #tpu.memory_space<vmem>>, vector<8x256xf32>
    %c0_118 = arith.constant 0 : index
    %c0_119 = arith.constant 0 : index
    %357 = vector.load %arg6[%c0_118, %c0_119] : memref<64x256xf32, #tpu.memory_space<vmem>>, vector<64x256xf32>
    %cst_120 = arith.constant dense<0.000000e+00> : vector<8x256xf32>
    %358 = tpu.matmul %352, %357, %cst_120 {dimension_numbers = #tpu.dot_dimension_numbers<[1], [0], [0], [1], [0, 0, 1, 1], [], []>} : vector<8x64xf32>, vector<64x256xf32>, vector<8x256xf32> -> vector<8x256xf32>
    %359 = arith.addf %356, %358 : vector<8x256xf32>
    %360 = vector.extract_strided_slice %359 {offsets = [0, 0], sizes = [8, 192], strides = [1, 1]} : vector<8x256xf32> to vector<8x192xf32>
    %361 = arith.negf %360 : vector<8x192xf32>
    %362 = math.exp %361 : vector<8x192xf32>
    %cst_121 = arith.constant 1.000000e+00 : f32
    %363 = vector.broadcast %cst_121 : f32 to vector<8x192xf32>
    %364 = arith.addf %363, %362 : vector<8x192xf32>
    %365 = arith.divf %363, %364 : vector<8x192xf32>
    %366 = vector.extract_strided_slice %359 {offsets = [0, 192], sizes = [8, 64], strides = [1, 1]} : vector<8x256xf32> to vector<8x64xf32>
    %367 = math.tanh %366 : vector<8x64xf32>
    %368 = vector.extract_strided_slice %365 {offsets = [0, 64], sizes = [8, 64], strides = [1, 1]} : vector<8x192xf32> to vector<8x64xf32>
    %369 = arith.mulf %368, %349 : vector<8x64xf32>
    %370 = vector.extract_strided_slice %365 {offsets = [0, 0], sizes = [8, 64], strides = [1, 1]} : vector<8x192xf32> to vector<8x64xf32>
    %371 = arith.mulf %370, %367 : vector<8x64xf32>
    %372 = arith.addf %369, %371 : vector<8x64xf32>
    %373 = vector.extract_strided_slice %365 {offsets = [0, 128], sizes = [8, 64], strides = [1, 1]} : vector<8x192xf32> to vector<8x64xf32>
    %374 = math.tanh %372 : vector<8x64xf32>
    %375 = arith.mulf %373, %374 : vector<8x64xf32>
    %c7_i32_122 = arith.constant 7 : i32
    %c8_i32_123 = arith.constant 8 : i32
    %376 = arith.muli %c7_i32_122, %c8_i32_123 : i32
    %377 = tpu.assume_multiple %376, 8 : i32
    %378 = arith.index_cast %377 : i32 to index
    %c0_124 = arith.constant 0 : index
    %379 = vector.load %arg13[%378, %c0_124] : memref<64x256xf32, #tpu.memory_space<vmem>>, vector<8x256xf32>
    %c0_125 = arith.constant 0 : index
    %c0_126 = arith.constant 0 : index
    %380 = vector.load %arg6[%c0_125, %c0_126] : memref<64x256xf32, #tpu.memory_space<vmem>>, vector<64x256xf32>
    %cst_127 = arith.constant dense<0.000000e+00> : vector<8x256xf32>
    %381 = tpu.matmul %375, %380, %cst_127 {dimension_numbers = #tpu.dot_dimension_numbers<[1], [0], [0], [1], [0, 0, 1, 1], [], []>} : vector<8x64xf32>, vector<64x256xf32>, vector<8x256xf32> -> vector<8x256xf32>
    %382 = arith.addf %379, %381 : vector<8x256xf32>
    %383 = vector.extract_strided_slice %382 {offsets = [0, 0], sizes = [8, 192], strides = [1, 1]} : vector<8x256xf32> to vector<8x192xf32>
    %384 = arith.negf %383 : vector<8x192xf32>
    %385 = math.exp %384 : vector<8x192xf32>
    %cst_128 = arith.constant 1.000000e+00 : f32
    %386 = vector.broadcast %cst_128 : f32 to vector<8x192xf32>
    %387 = arith.addf %386, %385 : vector<8x192xf32>
    %388 = arith.divf %386, %387 : vector<8x192xf32>
    %389 = vector.extract_strided_slice %382 {offsets = [0, 192], sizes = [8, 64], strides = [1, 1]} : vector<8x256xf32> to vector<8x64xf32>
    %390 = math.tanh %389 : vector<8x64xf32>
    %391 = vector.extract_strided_slice %388 {offsets = [0, 64], sizes = [8, 64], strides = [1, 1]} : vector<8x192xf32> to vector<8x64xf32>
    %392 = arith.mulf %391, %372 : vector<8x64xf32>
    %393 = vector.extract_strided_slice %388 {offsets = [0, 0], sizes = [8, 64], strides = [1, 1]} : vector<8x192xf32> to vector<8x64xf32>
    %394 = arith.mulf %393, %390 : vector<8x64xf32>
    %395 = arith.addf %392, %394 : vector<8x64xf32>
    %396 = vector.extract_strided_slice %388 {offsets = [0, 128], sizes = [8, 64], strides = [1, 1]} : vector<8x192xf32> to vector<8x64xf32>
    %397 = math.tanh %395 : vector<8x64xf32>
    %398 = arith.mulf %396, %397 : vector<8x64xf32>
    %c8_i32_129 = arith.constant 8 : i32
    %c0_130 = arith.constant 0 : index
    %c0_131 = arith.constant 0 : index
    %399 = vector.load %arg8[%c0_130, %c0_131] : memref<64x32xf32, #tpu.memory_space<vmem>>, vector<64x32xf32>
    %cst_132 = arith.constant dense<0.000000e+00> : vector<8x32xf32>
    %400 = tpu.matmul %398, %399, %cst_132 {dimension_numbers = #tpu.dot_dimension_numbers<[1], [0], [0], [1], [0, 0, 1, 1], [], []>} : vector<8x64xf32>, vector<64x32xf32>, vector<8x32xf32> -> vector<8x32xf32>
    %c0_133 = arith.constant 0 : index
    %c0_134 = arith.constant 0 : index
    %401 = vector.load %arg9[%c0_133, %c0_134] : memref<1x32xf32, #tpu.memory_space<vmem>>, vector<1x32xf32>
    %402 = vector.broadcast %401 : vector<1x32xf32> to vector<8x32xf32>
    %403 = arith.addf %400, %402 : vector<8x32xf32>
    %cst_135 = arith.constant 0.000000e+00 : f32
    %404 = vector.broadcast %cst_135 : f32 to vector<8x32xf32>
    %405 = arith.maximumf %403, %404 : vector<8x32xf32>
    %c0_136 = arith.constant 0 : index
    %c0_137 = arith.constant 0 : index
    %406 = vector.load %arg10[%c0_136, %c0_137] : memref<32x128xf32, #tpu.memory_space<vmem>>, vector<32x128xf32>
    %cst_138 = arith.constant dense<0.000000e+00> : vector<8x128xf32>
    %407 = tpu.matmul %405, %406, %cst_138 {dimension_numbers = #tpu.dot_dimension_numbers<[1], [0], [0], [1], [0, 0, 1, 1], [], []>} : vector<8x32xf32>, vector<32x128xf32>, vector<8x128xf32> -> vector<8x128xf32>
    %c0_139 = arith.constant 0 : index
    %c0_140 = arith.constant 0 : index
    %408 = vector.load %arg11[%c0_139, %c0_140] : memref<1x128xf32, #tpu.memory_space<vmem>>, vector<1x128xf32>
    %409 = vector.broadcast %408 : vector<1x128xf32> to vector<8x128xf32>
    %410 = arith.addf %407, %409 : vector<8x128xf32>
    %c0_141 = arith.constant 0 : index
    %c0_142 = arith.constant 0 : index
    %411 = vector.load %arg12[%c0_141, %c0_142] : memref<8x128xf32, #tpu.memory_space<vmem>>, vector<8x128xf32>
    tpu.vector_store %arg12[%c0_141, %c0_142], %410 {strides = array<i32>} : memref<8x128xf32, #tpu.memory_space<vmem>>, vector<8x128xf32>,
    return
  }
  func.func @transform_0(%arg0: i32) -> (i32, i32) {
    %c0_i32 = arith.constant 0 : i32
    %c0_i32_0 = arith.constant 0 : i32
    return %arg0, %c0_i32 : i32, i32
  }
  func.func @transform_1(%arg0: i32) -> (i32, i32) {
    %c0_i32 = arith.constant 0 : i32
    %c0_i32_0 = arith.constant 0 : i32
    %c0_i32_1 = arith.constant 0 : i32
    return %c0_i32, %c0_i32_0 : i32, i32
  }
  func.func @transform_2(%arg0: i32) -> (i32, i32) {
    %c0_i32 = arith.constant 0 : i32
    %c0_i32_0 = arith.constant 0 : i32
    %c0_i32_1 = arith.constant 0 : i32
    return %c0_i32, %c0_i32_0 : i32, i32
  }
  func.func @transform_3(%arg0: i32) -> (i32, i32) {
    %c0_i32 = arith.constant 0 : i32
    %c0_i32_0 = arith.constant 0 : i32
    %c0_i32_1 = arith.constant 0 : i32
    return %c0_i32, %c0_i32_0 : i32, i32
  }
  func.func @transform_4(%arg0: i32) -> (i32, i32) {
    %c0_i32 = arith.constant 0 : i32
    %c0_i32_0 = arith.constant 0 : i32
    %c0_i32_1 = arith.constant 0 : i32
    return %c0_i32, %c0_i32_0 : i32, i32
  }
  func.func @transform_5(%arg0: i32) -> (i32, i32) {
    %c0_i32 = arith.constant 0 : i32
    %c0_i32_0 = arith.constant 0 : i32
    %c0_i32_1 = arith.constant 0 : i32
    return %c0_i32, %c0_i32_0 : i32, i32
  }
  func.func @transform_6(%arg0: i32) -> (i32, i32) {
    %c0_i32 = arith.constant 0 : i32
    %c0_i32_0 = arith.constant 0 : i32
    %c0_i32_1 = arith.constant 0 : i32
    return %c0_i32, %c0_i32_0 : i32, i32
  }
  func.func @transform_7(%arg0: i32) -> (i32, i32) {
    %c0_i32 = arith.constant 0 : i32
    %c0_i32_0 = arith.constant 0 : i32
    %c0_i32_1 = arith.constant 0 : i32
    return %c0_i32, %c0_i32_0 : i32, i32
  }
  func.func @transform_8(%arg0: i32) -> (i32, i32) {
    %c0_i32 = arith.constant 0 : i32
    %c0_i32_0 = arith.constant 0 : i32
    %c0_i32_1 = arith.constant 0 : i32
    return %c0_i32, %c0_i32_0 : i32, i32
  }
  func.func @transform_9(%arg0: i32) -> (i32, i32) {
    %c0_i32 = arith.constant 0 : i32
    %c0_i32_0 = arith.constant 0 : i32
    %c0_i32_1 = arith.constant 0 : i32
    return %c0_i32, %c0_i32_0 : i32, i32
  }
  func.func @transform_10(%arg0: i32) -> (i32, i32) {
    %c0_i32 = arith.constant 0 : i32
    %c0_i32_0 = arith.constant 0 : i32
    %c0_i32_1 = arith.constant 0 : i32
    return %c0_i32, %c0_i32_0 : i32, i32
  }
  func.func @transform_11(%arg0: i32) -> (i32, i32) {
    %c0_i32 = arith.constant 0 : i32
    %c0_i32_0 = arith.constant 0 : i32
    return %arg0, %c0_i32 : i32, i32
  }
}

</mosaic_0001>

<bundles_post_ra>
// kernel: tpu_custom_call.1
= control target key start
LH: loop header
LB: loop body
LE: loop exit
PB: predicated region body
PF: predicated region fallthrough
CT: control target
= control target key end

     0   :  { %16 = vsyncpa [#allocation5], 0  ;;  %s3920_s0 = inlined_call_operand.vmem [shape: f32[64,10], index: 0, kind: input, shape index: {}]   ;;  %s3921_s1 = inlined_call_operand.hbm [shape: f32[10,256], index: 1, kind: input, shape index: {}]   ;;  %s3922_s2 = inlined_call_operand.vmem [shape: f32[64,256], index: 2, kind: input, shape index: {}]   ;;  %s3923_s3 = inlined_call_operand.vmem [shape: f32[1,256], index: 3, kind: input, shape index: {}]   ;;  %s3924_s4 = inlined_call_operand.hbm [shape: f32[64,256], index: 4, kind: input, shape index: {}]   ;;  %s3925_s5 = inlined_call_operand.hbm [shape: f32[64,256], index: 5, kind: input, shape index: {}]   ;;  %s3926_s6 = inlined_call_operand.vmem [shape: f32[1,256], index: 6, kind: input, shape index: {}]   ;;  %s3927_s7 = inlined_call_operand.vmem [shape: f32[64,32], index: 7, kind: input, shape index: {}]   ;;  %s3928_s8 = inlined_call_operand.vmem [shape: f32[1,32], index: 8, kind: input, shape index: {}]   ;;  %s3929_s9 = inlined_call_operand.vmem [shape: f32[32,128], index: 9, kind: input, shape index: {}]   ;;  %s3930_s10 = inlined_call_operand.vmem [shape: f32[1,128], index: 10, kind: input, shape index: {}]   ;;  %s3931_s11 = inlined_call_operand.hbm [shape: f32[8,128], index: 11, kind: output, shape index: {}]  }
   0x1   :  { %17 = vsyncpa [#allocation8], 0 }
   0x2   :  { %18 = vsyncpa [#allocation6], 0  ;;  %s3330_s17 = smov [#allocation7]   ;;  %s3331_s19 = smov [#allocation4]  }
   0x3   :  { %s42_s18 = sshll.u32 %s3330_s17, 4  ;;  %s26_s20 = sshll.u32 %s3331_s19, 4  ;;  %s43_s18 = int_to_ptr.vmem [resolvable:$true] %s42_s18  ;;  %s3401_s20 = int_to_ptr.vmem [resolvable:$true] %s26_s20 }
   0x4   :  { %s3236_s23 = scalar_lea.hbm %s3924_s4, 2048 }
   0x5   :  { %p3237_p0 = scmp.ne.s32.totalorder %s3924_s4, %s3236_s23  ;;  %p3240_p1 = scmp.lt.u32.totalorder %s3236_s23, %s3924_s4 }
   0x7   :  { %p3242_p2 = pnand %p3240_p1, %p3237_p0 }
   0x9   :  { %3245 = shalt.err (!%p3242_p2)
}
   0xa   :  { %s3246_s28 = scalar_lea.vmem %s43_s18, 2048  ;;  %p3251_p4 = scmp.lt.s32.totalorder %s43_s18, %s43_s18 }
   0xb   :  { %p3247_p3 = scmp.ne.s32.totalorder %s43_s18, %s3246_s28  ;;  %p3252_p5 = scmp.lt.s32.totalorder %s3246_s28, %s3246_s28 }
   0xd   :  { %p3253_p6 = por %p3252_p5, %p3251_p4 }
   0xf   :  { %p3254_p7 = pnand %p3253_p6, %p3247_p3 }
  0x11   :  { %3257 = shalt.err (!%p3254_p7)
}
  0x12   :  { %s3332_s29 = smov 256   ;;  %s3333_s30 = smov 16  }
  0x13   :  { %48 = dma.hbm_to_vmem [thread:$0]  %s3924_s4, 2048, %s43_s18, [#allocation8], %s3332_s29, %s3332_s29, %s3333_s30  }
  0x14   :  { %s3258_s16 = scalar_lea.hbm %s3921_s1, 512 }
  0x15   :  { %p3259_p8 = scmp.ne.s32.totalorder %s3921_s1, %s3258_s16  ;;  %p3262_p9 = scmp.lt.u32.totalorder %s3258_s16, %s3921_s1 }
  0x17   :  { %p3264_p10 = pnand %p3262_p9, %p3259_p8 }
  0x19   :  { %3267 = shalt.err (!%p3264_p10)
}
  0x1a   :  { %s3268_s23 = scalar_lea.vmem %s3401_s20, 512  ;;  %p3273_p12 = scmp.lt.s32.totalorder %s3401_s20, %s3401_s20 }
  0x1b   :  { %p3269_p11 = scmp.ne.s32.totalorder %s3401_s20, %s3268_s23  ;;  %p3274_p13 = scmp.lt.s32.totalorder %s3268_s23, %s3268_s23 }
  0x1d   :  { %p3275_p0 = por %p3274_p13, %p3273_p12 }
  0x1f   :  { %p3276_p1 = pnand %p3275_p0, %p3269_p11 }
  0x21   :  { %3279 = shalt.err (!%p3276_p1)
}
  0x22   :  { %32 = dma.hbm_to_vmem [thread:$0]  %s3921_s1, 512, %s3401_s20, [#allocation5], %s3332_s29, %s3332_s29, %s3333_s30  }
  0x23   :  { %s3334_s24 = smov [#allocation9]   ;;  %s3280_s28 = scalar_lea.hbm %s3925_s5, 2048 }
  0x24   :  { %s54_s25 = sshll.u32 %s3334_s24, 4  ;;  %p3281_p2 = scmp.ne.s32.totalorder %s3925_s5, %s3280_s28  ;;  %s55_s25 = int_to_ptr.vmem [resolvable:$true] %s54_s25 }
  0x25   :  { %p3284_p3 = scmp.lt.u32.totalorder %s3280_s28, %s3925_s5 }
  0x27   :  { %p3286_p4 = pnand %p3284_p3, %p3281_p2 }
  0x29   :  { %3289 = shalt.err (!%p3286_p4)
}
  0x2a   :  { %s3290_s16 = scalar_lea.vmem %s55_s25, 2048  ;;  %p3295_p6 = scmp.lt.s32.totalorder %s55_s25, %s55_s25 }
  0x2b   :  { %p3291_p5 = scmp.ne.s32.totalorder %s55_s25, %s3290_s16  ;;  %p3296_p7 = scmp.lt.s32.totalorder %s3290_s16, %s3290_s16 }
  0x2d   :  { %p3297_p8 = por %p3296_p7, %p3295_p6 }
  0x2f   :  { %p3298_p9 = pnand %p3297_p8, %p3291_p5 }
  0x31   :  { %3301 = shalt.err (!%p3298_p9)
}
  0x32   :  { %60 = dma.hbm_to_vmem [thread:$0]  %s3925_s5, 2048, %s55_s25, [#allocation8], %s3332_s29, %s3332_s29, %s3333_s30  }
  0x33   :  { %3324 = dma.done.wait [#allocation5], 512  }
  0x34   :  { %3325 = vsyncadd [#allocation5], 4294966784 }
  0x35   :  { %3326 = dma.done.wait [#allocation8], 4096  }
  0x36   :  { %3327 = vsyncadd [#allocation8], 4294963200  ;;  %v3335_v0 = vmov 0.0   ;;  %vm129_vm0 = vcmask 1041408   ;;  %vm3336_vm1 = vmmov 1   ;;  %v89_v1 = vld [vmem:[#allocation4 + $0x8] sm:$0xff]  ;;  %v94_v39 = vlaneseq }
  0x37   :  { %200 = vmatprep.mubr.f32.mxu0 %v3335_v0  ;;  %1421 = vmatprep.mubr.f32.mxu1 %v3335_v0  ;;  %vm2674_vm2 = vmpackc.low %vm129_vm0, %vm3336_vm1  ;;  %v91_v2 = vld [vmem:[#allocation4 + $0x18] sm:$0x3]  ;;  %v88_v3 = vld [vmem:[#allocation4] sm:$0xff]  ;;  %vm104_vm3 = vcmask 80896   ;;  %s3337_s30 = smov 64   ;;  %vm286_vm4 = vcmask 523264  }
  0x38   :  { %v2673_v4 = vpack.c.bf16 %v91_v2, %v89_v1  ;;  %v90_v5 = vld [vmem:[#allocation4 + $0x10] sm:$0x3]  ;;  %v271_v6 = vld [vmem:[%s3922_s2 + $0x8] sm:$0xff]  ;;  %v273_v8 = vld [vmem:[%s3922_s2 + $0x18] sm:$0xff]  ;;  %v3578_v40 = vshrl.u32 %v94_v39, 7  ;;  %vm3339_vm5 = vmmov 0  }
  0x39   :  { %v2676_v7 = vpack.c.bf16 %v90_v5, %v88_v3  ;;  %v270_v9 = vld [vmem:[%s3922_s2] sm:$0xff]  ;;  %v272_v10 = vld [vmem:[%s3922_s2 + $0x10] sm:$0xff]  ;;  %v3467_v11 = vpack.c.bf16 %v273_v8, %v271_v6  ;;  %v275_v12 = vld [vmem:[%s3922_s2 + $0x28] sm:$0xff]  ;;  %vm2463_vm6 = vcmask 261120   ;;  %s3340_s22 = smov [#allocation10]  }
  0x3a   :  { %2675 = vmatprep.subr.msk.bf16.mxu0 %vm2674_vm2, %v2673_v4  ;;  %v80_v13 = vld [vmem:[%s3920_s0] sm:$0xff]  ;;  %v3475_v14 = vpack.c.bf16 %v272_v10, %v270_v9  ;;  %v277_v15 = vld [vmem:[%s3922_s2 + $0x38] sm:$0xff]  ;;  %v276_v18 = vld [vmem:[%s3922_s2 + $0x30] sm:$0xff]  ;;  %v100_v41 = vsub.s32 1, %v3578_v40  ;;  %v96_v48 = vsub.s32 0, %v3578_v40  ;;  %s2544_s23 = sshll.u32 %s3340_s22, 4  ;;  %s2545_s23 = int_to_ptr.vmem [resolvable:$true] %s2544_s23 }
  0x3b   :  { %2678 = vmatpush1.bf16.msk.msra.mxu0 %vm2674_vm2, %v2676_v7  ;;  %v3481_v16 = vpack.c.bf16 %v277_v15, %v275_v12  ;;  %v274_v17 = vld [vmem:[%s3922_s2 + $0x20] sm:$0xff]  ;;  %v279_v19 = vld [vmem:[%s3922_s2 + $0x48] sm:$0xff]  ;;  %v281_v20 = vld [vmem:[%s3922_s2 + $0x58] sm:$0xff]  ;;  %p3307_p11 = scmp.lt.s32.totalorder %s2545_s23, %s2545_s23 }
  0x3c   :  { %2680 = vmatprep.subr.bf16.mxu0 %v3467_v11  ;;  %v81_v21 = vld [vmem:[%s3920_s0 + $0x8] sm:$0xff]  ;;  %v3501_v22 = vpack.c.bf16 %v276_v18, %v274_v17  ;;  %v3504_v23 = vpack.c.bf16 %v281_v20, %v279_v19  ;;  %v278_v24 = vld [vmem:[%s3922_s2 + $0x40] sm:$0xff]  ;;  %v280_v25 = vld [vmem:[%s3922_s2 + $0x50] sm:$0xff] }
  0x3d   :  { %v283_v26 = vld [vmem:[%s3922_s2 + $0x68] sm:$0xff]  ;;  %v285_v27 = vld [vmem:[%s3922_s2 + $0x78] sm:$0xff]  ;;  %v82_v28 = vld [vmem:[%s3920_s0 + $0x10] sm:$0xff]  ;;  %v3524_v29 = vpack.c.bf16 %v280_v25, %v278_v24 }
  0x3e   :  { %2563 = vmatmul.mubr.msk.f32.vlgmr.msra.gmra.mrb[0].mxu0 %vm104_vm3, %v80_v13  ;;  %v3527_v30 = vpack.c.bf16 %v285_v27, %v283_v26  ;;  %v282_v31 = vld [vmem:[%s3922_s2 + $0x60] sm:$0xff]  ;;  %v284_v32 = vld [vmem:[%s3922_s2 + $0x70] sm:$0xff]  ;;  %v83_v33 = vld [vmem:[%s3920_s0 + $0x18] sm:$0xff] }
  0x3f   :  { %2682 = vmatpush1.bf16.msra.mxu0 %v3475_v14  ;;  %206 = vmatprep.mubr.f32.mxu0 %v3335_v0  ;;  %v3541_v34 = vpack.c.bf16 %v284_v32, %v282_v31  ;;  %v84_v35 = vld [vmem:[%s3920_s0 + $0x20] sm:$0xff]  ;;  %v85_v36 = vld [vmem:[%s3920_s0 + $0x28] sm:$0xff]  ;;  %v86_v37 = vld [vmem:[%s3920_s0 + $0x30] sm:$0xff] }
  0x40   :  { %2684 = vmatprep.subr.bf16.mxu0 %v3481_v16  ;;  %v87_v38 = vld [vmem:[%s3920_s0 + $0x38] sm:$0xff]  ;;  %v92_v42 = vld [vmem:[%s3923_s3] sm:$0x3]  ;;  %v1306_v57 = vld [vmem:[#allocation7 + $0x8] sm:$0xff] }
  0x41   :  { %v3586_v43 = vrot.slane %v92_v42, %v100_v41  ;;  %v3593_v49 = vrot.slane %v92_v42, %v96_v48  ;;  %v1308_v58 = vld [vmem:[#allocation7 + $0x18] sm:$0xff]  ;;  %v1305_v59 = vld [vmem:[#allocation7] sm:$0xff]  ;;  %v1307_v61 = vld [vmem:[#allocation7 + $0x10] sm:$0xff] }
  0x42   :  { %2564 = vmatmul.mubr.msk.f32.gmra.mrb[2].mxu0 %vm104_vm3, %v81_v21  ;;  %v2807_v60 = vpack.c.bf16 %v1308_v58, %v1306_v57  ;;  %v1310_v62 = vld [vmem:[#allocation7 + $0x28] sm:$0xff]  ;;  %v1312_v63 = vld [vmem:[#allocation7 + $0x38] sm:$0xff]  ;;  %v2809_v1 = vpack.c.bf16 %v1307_v61, %v1305_v59  ;;  %v1309_v3 = vld [vmem:[#allocation7 + $0x20] sm:$0xff] }
  0x43   :  { %212 = vmatprep.mubr.f32.mxu0 %v3335_v0  ;;  %2686 = vmatpush1.bf16.msra.mxu0 %v3501_v22  ;;  %v2811_v2 = vpack.c.bf16 %v1312_v63, %v1310_v62  ;;  %v1311_v4 = vld [vmem:[#allocation7 + $0x30] sm:$0xff]  ;;  %v1314_v8 = vld [vmem:[#allocation7 + $0x48] sm:$0xff]  ;;  %v1316_v9 = vld [vmem:[#allocation7 + $0x58] sm:$0xff] }
  0x44   :  { %2688 = vmatprep.subr.bf16.mxu0 %v3504_v23  ;;  %2808 = vmatprep.subr.bf16.mxu1 %v2807_v60  ;;  %v2813_v5 = vpack.c.bf16 %v1311_v4, %v1309_v3  ;;  %v2815_v12 = vpack.c.bf16 %v1316_v9, %v1314_v8  ;;  %v1313_v13 = vld [vmem:[#allocation7 + $0x40] sm:$0xff]  ;;  %v1315_v15 = vld [vmem:[#allocation7 + $0x50] sm:$0xff]  ;;  %v1318_v18 = vld [vmem:[#allocation7 + $0x68] sm:$0xff] }
  0x45   :  { %2810 = vmatpush1.bf16.msra.mxu1 %v2809_v1  ;;  %v2817_v17 = vpack.c.bf16 %v1315_v15, %v1313_v13  ;;  %v1320_v19 = vld [vmem:[#allocation7 + $0x78] sm:$0xff]  ;;  %v1317_v20 = vld [vmem:[#allocation7 + $0x60] sm:$0xff]  ;;  %v1319_v24 = vld [vmem:[#allocation7 + $0x70] sm:$0xff] }
  0x46   :  { %2565 = vmatmul.mubr.msk.f32.gmra.mrb[4].mxu0 %vm104_vm3, %v82_v28  ;;  %2812 = vmatprep.subr.bf16.mxu1 %v2811_v2  ;;  %v2819_v21 = vpack.c.bf16 %v1320_v19, %v1318_v18  ;;  %v2821_v25 = vpack.c.bf16 %v1319_v24, %v1317_v20 }
  0x47   :  { %218 = vmatprep.mubr.f32.mxu0 %v3335_v0  ;;  %2690 = vmatpush1.bf16.msra.mxu0 %v3524_v29 }
  0x48   :  { %2692 = vmatprep.subr.bf16.mxu0 %v3527_v30 }
  0x49   :  { %2814 = vmatpush1.bf16.msra.mxu1 %v2813_v5 }
  0x4a   :  { %2566 = vmatmul.mubr.msk.f32.gmra.mrb[6].mxu0 %vm104_vm3, %v83_v33  ;;  %2816 = vmatprep.subr.bf16.mxu1 %v2815_v12 }
  0x4b   :  { %224 = vmatprep.mubr.f32.mxu0 %v3335_v0  ;;  %2694 = vmatpush1.bf16.msra.mxu0 %v3541_v34 }
  0x4c   :  { %2696 = vmatprep.subr.bf16.mxu0 %v3467_v11 }
  0x4d   :  { %2818 = vmatpush1.bf16.msra.mxu1 %v2817_v17 }
  0x4e   :  { %2567 = vmatmul.mubr.msk.f32.gmra.mrb[8].mxu0 %vm104_vm3, %v84_v35  ;;  %2820 = vmatprep.subr.bf16.mxu1 %v2819_v21 }
  0x4f   :  { %230 = vmatprep.mubr.f32.mxu0 %v3335_v0 }
  0x51   :  { %2822 = vmatpush1.bf16.msra.mxu1 %v2821_v25 }
  0x52   :  { %2568 = vmatmul.mubr.msk.f32.gmra.mrb[10].mxu0 %vm104_vm3, %v85_v36 }
  0x53   :  { %236 = vmatprep.mubr.f32.mxu0 %v3335_v0 }
  0x56   :  { %2569 = vmatmul.mubr.msk.f32.gmra.mrb[12].mxu0 %vm104_vm3, %v86_v37 }
  0x57   :  { %242 = vmatprep.mubr.f32.mxu0 %v3335_v0 }
  0x5a   :  { %2570 = vmatmul.mubr.msk.f32.gmra.mrb[14].mxu0 %vm104_vm3, %v87_v38 }
  0x5b   :  { %354 = vmatprep.mubr.f32.mxu0 %v3335_v0 }
  0x5e   :  { %355 = vmatmul.mubr.f32.vlgmr.msra.gmra.mrb[0].mxu0 %v3335_v0 }
  0x5f   :  { %2698 = vmatpush1.bf16.msra.mxu0 %v3475_v14  ;;  %482 = vmatprep.mubr.f32.mxu0 %v3335_v0 }
  0x60   :  { %2700 = vmatprep.subr.bf16.mxu0 %v3481_v16 }
  0x63   :  { %2702 = vmatpush1.bf16.msra.mxu0 %v3501_v22 }
  0x64   :  { %2704 = vmatprep.subr.bf16.mxu0 %v3504_v23 }
  0x67   :  { %2706 = vmatpush1.bf16.msra.mxu0 %v3524_v29 }
  0x68   :  { %2708 = vmatprep.subr.bf16.mxu0 %v3527_v30 }
  0x6b   :  { %2710 = vmatpush1.bf16.msra.mxu0 %v3541_v34 }
  0x6c   :  { %2712 = vmatprep.subr.bf16.mxu0 %v3467_v11 }
 0x131   :  { %v356_v44 = vpop.f32.mrb[0].mxu0 }
 0x132   :  { %v358_v45 = vpop.f32.mrb[1].mxu0  ;;  %v2969_v50 = vadd.f32 %v356_v44, %v3593_v49 }
 0x133   :  { %v2970_v46 = vadd.f32 %v358_v45, %v3586_v43 }
 0x134   :  { %v2571_v51 = vmul.f32 -1.442695, %v2969_v50 }
 0x135   :  { %3044 = vtanh.f32 %v2970_v46  ;;  %v2572_v27 = vmul.f32 -1.442695, %v2970_v46 }
 0x136   :  { %3046 = vpow2.f32 %v2571_v51 }
 0x13f   :  { %v3045_v47 = vpop.eup %3044 }
 0x140   :  { %378 = vrot.lane.b32.xlu0 %v3045_v47, %s3337_s30  ;;  %v3047_v52 = vpop.eup %3046 }
 0x141   :  { %v369_v53 = vadd.f32 1.0, %v3047_v52 }
 0x143   :  { %3048 = vrcp.f32 %v369_v53 }
 0x14d   :  { %v3049_v54 = vpop.eup %3048 }
 0x14e   :  { %v376_v6 = vmul.f32 0.0, %v3049_v54 }
 0x1b2   :  { %v379_v55 = vpop.permute.xlu0 %378 }
 0x1b3   :  { %v381_v56 = vmul.f32 %v3049_v54, %v379_v55 }
 0x1b5   :  { %383 = vrot.lane.b32.xlu0 %v381_v56, %s3337_s30 }
 0x227   :  { %v384_v7 = vpop.permute.xlu0 %383 }
 0x228   :  { %v386_v10 = vadd.f32 %v384_v7, %v376_v6 }
 0x22a   :  { %3050 = vtanh.f32 %v386_v10 }
 0x22b   :  { %3052 = vpow2.f32 %v2572_v27 }
 0x234   :  { %v3051_v26 = vpop.eup %3050 }
 0x235   :  { %389 = vrot.lane.b32.xlu1 %v3051_v26, %s3337_s30  ;;  %v3053_v28 = vpop.eup %3052 }
 0x236   :  { %v370_v31 = vadd.f32 1.0, %v3053_v28 }
 0x238   :  { %3054 = vrcp.f32 %v370_v31 }
 0x242   :  { %v3055_v32 = vpop.eup %3054 }
 0x2a7   :  { %v390_v33 = vpop.permute.xlu1 %389 }
 0x2a8   :  { %v392_v35 = vmul.f32 %v3055_v32, %v390_v33 }
 0x2aa   :  { %393 = vst.msk [vmem:[#allocation3] sm:$0xff] %vm286_vm4, %v392_v35  ;;  %2573 = vmatmul.mubr.msk.f32.vlgmr.msra.gmra.mrb[2].mxu0 %vm286_vm4, %v392_v35 }
 0x2ab   :  { %2714 = vmatpush1.bf16.msra.mxu0 %v3475_v14  ;;  %611 = vmatprep.mubr.f32.mxu0 %v3335_v0 }
 0x2ac   :  { %2716 = vmatprep.subr.bf16.mxu0 %v3481_v16 }
 0x2af   :  { %2718 = vmatpush1.bf16.msra.mxu0 %v3501_v22 }
 0x2b0   :  { %2720 = vmatprep.subr.bf16.mxu0 %v3504_v23 }
 0x2b1   :  { %v1297_v36 = vld [vmem:[#allocation3] sm:$0xff] }
 0x2b2   :  { %2594 = vmatmul.mubr.msk.f32.vlgmr.msra.gmra.mrb[0].mxu1 %vm286_vm4, %v1297_v36 }
 0x2b3   :  { %2722 = vmatpush1.bf16.msra.mxu0 %v3524_v29  ;;  %1427 = vmatprep.mubr.f32.mxu1 %v3335_v0 }
 0x2b4   :  { %2724 = vmatprep.subr.bf16.mxu0 %v3527_v30 }
 0x2b7   :  { %2726 = vmatpush1.bf16.msra.mxu0 %v3541_v34 }
 0x2b8   :  { %2728 = vmatprep.subr.bf16.mxu0 %v3467_v11 }
 0x37d   :  { %v484_v37 = vpop.f32.mrb[2].mxu0 }
 0x37e   :  { %v486_v38 = vpop.f32.mrb[3].mxu0  ;;  %v2971_v44 = vadd.f32 %v484_v37, %v3593_v49 }
 0x37f   :  { %v2972_v39 = vadd.f32 %v486_v38, %v3586_v43 }
 0x380   :  { %v2574_v45 = vmul.f32 -1.442695, %v2971_v44 }
 0x381   :  { %3056 = vtanh.f32 %v2972_v39  ;;  %v2575_v57 = vmul.f32 -1.442695, %v2972_v39 }
 0x382   :  { %3058 = vpow2.f32 %v2574_v45 }
 0x38b   :  { %v3057_v42 = vpop.eup %3056 }
 0x38c   :  { %506 = vrot.lane.b32.xlu1 %v3057_v42, %s3337_s30  ;;  %v3059_v46 = vpop.eup %3058 }
 0x38d   :  { %v497_v47 = vadd.f32 1.0, %v3059_v46 }
 0x38f   :  { %3060 = vrcp.f32 %v497_v47 }
 0x399   :  { %v3061_v50 = vpop.eup %3060 }
 0x39a   :  { %v504_v53 = vmul.f32 %v3061_v50, %v386_v10 }
 0x3fe   :  { %v507_v51 = vpop.permute.xlu1 %506 }
 0x3ff   :  { %v509_v52 = vmul.f32 %v3061_v50, %v507_v51 }
 0x401   :  { %511 = vrot.lane.b32.xlu0 %v509_v52, %s3337_s30 }
 0x473   :  { %v512_v54 = vpop.permute.xlu0 %511 }
 0x474   :  { %v514_v55 = vadd.f32 %v512_v54, %v504_v53 }
 0x476   :  { %3062 = vtanh.f32 %v514_v55 }
 0x477   :  { %3064 = vpow2.f32 %v2575_v57 }
 0x480   :  { %v3063_v56 = vpop.eup %3062 }
 0x481   :  { %517 = vrot.lane.b32.xlu1 %v3063_v56, %s3337_s30  ;;  %v3065_v58 = vpop.eup %3064 }
 0x482   :  { %v498_v59 = vadd.f32 1.0, %v3065_v58 }
 0x484   :  { %3066 = vrcp.f32 %v498_v59 }
 0x48e   :  { %v3067_v60 = vpop.eup %3066 }
 0x4f3   :  { %v518_v61 = vpop.permute.xlu1 %517 }
 0x4f4   :  { %v520_v62 = vmul.f32 %v3067_v60, %v518_v61 }
 0x4f6   :  { %522 = vst.msk [vmem:[#allocation3 + $0x8] sm:$0xff] %vm286_vm4, %v520_v62  ;;  %2576 = vmatmul.mubr.msk.f32.vlgmr.msra.gmra.mrb[4].mxu0 %vm286_vm4, %v520_v62 }
 0x4f7   :  { %2730 = vmatpush1.bf16.msra.mxu0 %v3475_v14  ;;  %740 = vmatprep.mubr.f32.mxu0 %v3335_v0 }
 0x4f8   :  { %2732 = vmatprep.subr.bf16.mxu0 %v3481_v16 }
 0x4fb   :  { %2734 = vmatpush1.bf16.msra.mxu0 %v3501_v22 }
 0x4fc   :  { %2736 = vmatprep.subr.bf16.mxu0 %v3504_v23 }
 0x4fd   :  { %v1298_v63 = vld [vmem:[#allocation3 + $0x8] sm:$0xff] }
 0x4fe   :  { %2595 = vmatmul.mubr.msk.f32.gmra.mrb[2].mxu1 %vm286_vm4, %v1298_v63 }
 0x4ff   :  { %2738 = vmatpush1.bf16.msra.mxu0 %v3524_v29  ;;  %1433 = vmatprep.mubr.f32.mxu1 %v3335_v0 }
 0x500   :  { %2740 = vmatprep.subr.bf16.mxu0 %v3527_v30 }
 0x503   :  { %2742 = vmatpush1.bf16.msra.mxu0 %v3541_v34 }
 0x504   :  { %2744 = vmatprep.subr.bf16.mxu0 %v3467_v11 }
 0x5c9   :  { %v613_v1 = vpop.f32.mrb[4].mxu0 }
 0x5ca   :  { %v615_v2 = vpop.f32.mrb[5].mxu0  ;;  %v2973_v5 = vadd.f32 %v613_v1, %v3593_v49 }
 0x5cb   :  { %v2974_v3 = vadd.f32 %v615_v2, %v3586_v43 }
 0x5cc   :  { %v2577_v6 = vmul.f32 -1.442695, %v2973_v5 }
 0x5cd   :  { %3068 = vtanh.f32 %v2974_v3  ;;  %v2578_v19 = vmul.f32 -1.442695, %v2974_v3 }
 0x5ce   :  { %3070 = vpow2.f32 %v2577_v6 }
 0x5d7   :  { %v3069_v4 = vpop.eup %3068 }
 0x5d8   :  { %635 = vrot.lane.b32.xlu0 %v3069_v4, %s3337_s30  ;;  %v3071_v7 = vpop.eup %3070 }
 0x5d9   :  { %v626_v8 = vadd.f32 1.0, %v3071_v7 }
 0x5db   :  { %3072 = vrcp.f32 %v626_v8 }
 0x5e5   :  { %v3073_v9 = vpop.eup %3072 }
 0x5e6   :  { %v633_v13 = vmul.f32 %v3073_v9, %v514_v55 }
 0x64a   :  { %v636_v10 = vpop.permute.xlu0 %635 }
 0x64b   :  { %v638_v12 = vmul.f32 %v3073_v9, %v636_v10 }
 0x64d   :  { %640 = vrot.lane.b32.xlu1 %v638_v12, %s3337_s30 }
 0x6bf   :  { %v641_v15 = vpop.permute.xlu1 %640 }
 0x6c0   :  { %v643_v17 = vadd.f32 %v641_v15, %v633_v13 }
 0x6c2   :  { %3074 = vtanh.f32 %v643_v17 }
 0x6c3   :  { %3076 = vpow2.f32 %v2578_v19 }
 0x6cc   :  { %v3075_v18 = vpop.eup %3074 }
 0x6cd   :  { %646 = vrot.lane.b32.xlu0 %v3075_v18, %s3337_s30  ;;  %v3077_v20 = vpop.eup %3076 }
 0x6ce   :  { %v627_v21 = vadd.f32 1.0, %v3077_v20 }
 0x6d0   :  { %3078 = vrcp.f32 %v627_v21 }
 0x6da   :  { %v3079_v24 = vpop.eup %3078 }
 0x73f   :  { %v647_v25 = vpop.permute.xlu0 %646 }
 0x740   :  { %v649_v26 = vmul.f32 %v3079_v24, %v647_v25 }
 0x742   :  { %651 = vst.msk [vmem:[#allocation3 + $0x10] sm:$0xff] %vm286_vm4, %v649_v26  ;;  %2579 = vmatmul.mubr.msk.f32.vlgmr.msra.gmra.mrb[6].mxu0 %vm286_vm4, %v649_v26 }
 0x743   :  { %2746 = vmatpush1.bf16.msra.mxu0 %v3475_v14  ;;  %869 = vmatprep.mubr.f32.mxu0 %v3335_v0 }
 0x744   :  { %2748 = vmatprep.subr.bf16.mxu0 %v3481_v16 }
 0x747   :  { %2750 = vmatpush1.bf16.msra.mxu0 %v3501_v22 }
 0x748   :  { %2752 = vmatprep.subr.bf16.mxu0 %v3504_v23 }
 0x749   :  { %v1299_v27 = vld [vmem:[#allocation3 + $0x10] sm:$0xff] }
 0x74a   :  { %2596 = vmatmul.mubr.msk.f32.gmra.mrb[4].mxu1 %vm286_vm4, %v1299_v27 }
 0x74b   :  { %2754 = vmatpush1.bf16.msra.mxu0 %v3524_v29  ;;  %1439 = vmatprep.mubr.f32.mxu1 %v3335_v0 }
 0x74c   :  { %2756 = vmatprep.subr.bf16.mxu0 %v3527_v30 }
 0x74f   :  { %2758 = vmatpush1.bf16.msra.mxu0 %v3541_v34 }
 0x750   :  { %2760 = vmatprep.subr.bf16.mxu0 %v3467_v11 }
 0x815   :  { %v742_v28 = vpop.f32.mrb[6].mxu0 }
 0x816   :  { %v744_v31 = vpop.f32.mrb[7].mxu0  ;;  %v2975_v35 = vadd.f32 %v742_v28, %v3593_v49 }
 0x817   :  { %v2976_v32 = vadd.f32 %v744_v31, %v3586_v43 }
 0x818   :  { %v2580_v36 = vmul.f32 -1.442695, %v2975_v35 }
 0x819   :  { %3080 = vtanh.f32 %v2976_v32  ;;  %v2581_v51 = vmul.f32 -1.442695, %v2976_v32 }
 0x81a   :  { %3082 = vpow2.f32 %v2580_v36 }
 0x823   :  { %v3081_v33 = vpop.eup %3080 }
 0x824   :  { %764 = vrot.lane.b32.xlu1 %v3081_v33, %s3337_s30  ;;  %v3083_v37 = vpop.eup %3082 }
 0x825   :  { %v755_v38 = vadd.f32 1.0, %v3083_v37 }
 0x827   :  { %3084 = vrcp.f32 %v755_v38 }
 0x831   :  { %v3085_v39 = vpop.eup %3084 }
 0x832   :  { %v762_v45 = vmul.f32 %v3085_v39, %v643_v17 }
 0x896   :  { %v765_v42 = vpop.permute.xlu1 %764 }
 0x897   :  { %v767_v44 = vmul.f32 %v3085_v39, %v765_v42 }
 0x899   :  { %769 = vrot.lane.b32.xlu0 %v767_v44, %s3337_s30 }
 0x90b   :  { %v770_v46 = vpop.permute.xlu0 %769 }
 0x90c   :  { %v772_v47 = vadd.f32 %v770_v46, %v762_v45 }
 0x90e   :  { %3086 = vtanh.f32 %v772_v47 }
 0x90f   :  { %3088 = vpow2.f32 %v2581_v51 }
 0x918   :  { %v3087_v50 = vpop.eup %3086 }
 0x919   :  { %775 = vrot.lane.b32.xlu1 %v3087_v50, %s3337_s30  ;;  %v3089_v52 = vpop.eup %3088 }
 0x91a   :  { %v756_v53 = vadd.f32 1.0, %v3089_v52 }
 0x91c   :  { %3090 = vrcp.f32 %v756_v53 }
 0x926   :  { %v3091_v54 = vpop.eup %3090 }
 0x98b   :  { %v776_v55 = vpop.permute.xlu1 %775 }
 0x98c   :  { %v778_v56 = vmul.f32 %v3091_v54, %v776_v55 }
 0x98e   :  { %780 = vst.msk [vmem:[#allocation3 + $0x18] sm:$0xff] %vm286_vm4, %v778_v56  ;;  %2582 = vmatmul.mubr.msk.f32.vlgmr.msra.gmra.mrb[8].mxu0 %vm286_vm4, %v778_v56 }
 0x98f   :  { %2762 = vmatpush1.bf16.msra.mxu0 %v3475_v14  ;;  %998 = vmatprep.mubr.f32.mxu0 %v3335_v0 }
 0x990   :  { %2764 = vmatprep.subr.bf16.mxu0 %v3481_v16 }
 0x993   :  { %2766 = vmatpush1.bf16.msra.mxu0 %v3501_v22 }
 0x994   :  { %2768 = vmatprep.subr.bf16.mxu0 %v3504_v23 }
 0x995   :  { %v1300_v57 = vld [vmem:[#allocation3 + $0x18] sm:$0xff] }
 0x996   :  { %2597 = vmatmul.mubr.msk.f32.gmra.mrb[6].mxu1 %vm286_vm4, %v1300_v57 }
 0x997   :  { %2770 = vmatpush1.bf16.msra.mxu0 %v3524_v29  ;;  %1445 = vmatprep.mubr.f32.mxu1 %v3335_v0 }
 0x998   :  { %2772 = vmatprep.subr.bf16.mxu0 %v3527_v30 }
 0x99b   :  { %2774 = vmatpush1.bf16.msra.mxu0 %v3541_v34 }
 0x99c   :  { %2776 = vmatprep.subr.bf16.mxu0 %v3467_v11 }
 0xa61   :  { %v871_v58 = vpop.f32.mrb[8].mxu0 }
 0xa62   :  { %v873_v59 = vpop.f32.mrb[9].mxu0  ;;  %v2977_v62 = vadd.f32 %v871_v58, %v3593_v49 }
 0xa63   :  { %v2978_v60 = vadd.f32 %v873_v59, %v3586_v43 }
 0xa64   :  { %v2583_v63 = vmul.f32 -1.442695, %v2977_v62 }
 0xa65   :  { %3092 = vtanh.f32 %v2978_v60  ;;  %v2584_v10 = vmul.f32 -1.442695, %v2978_v60 }
 0xa66   :  { %3094 = vpow2.f32 %v2583_v63 }
 0xa6f   :  { %v3093_v61 = vpop.eup %3092 }
 0xa70   :  { %893 = vrot.lane.b32.xlu0 %v3093_v61, %s3337_s30  ;;  %v3095_v1 = vpop.eup %3094 }
 0xa71   :  { %v884_v2 = vadd.f32 1.0, %v3095_v1 }
 0xa73   :  { %3096 = vrcp.f32 %v884_v2 }
 0xa7d   :  { %v3097_v3 = vpop.eup %3096 }
 0xa7e   :  { %v891_v6 = vmul.f32 %v3097_v3, %v772_v47 }
 0xae2   :  { %v894_v4 = vpop.permute.xlu0 %893 }
 0xae3   :  { %v896_v5 = vmul.f32 %v3097_v3, %v894_v4 }
 0xae5   :  { %898 = vrot.lane.b32.xlu1 %v896_v5, %s3337_s30 }
 0xb57   :  { %v899_v7 = vpop.permute.xlu1 %898 }
 0xb58   :  { %v901_v8 = vadd.f32 %v899_v7, %v891_v6 }
 0xb5a   :  { %3098 = vtanh.f32 %v901_v8 }
 0xb5b   :  { %3100 = vpow2.f32 %v2584_v10 }
 0xb64   :  { %v3099_v9 = vpop.eup %3098 }
 0xb65   :  { %904 = vrot.lane.b32.xlu0 %v3099_v9, %s3337_s30  ;;  %v3101_v12 = vpop.eup %3100 }
 0xb66   :  { %v885_v13 = vadd.f32 1.0, %v3101_v12 }
 0xb68   :  { %3102 = vrcp.f32 %v885_v13 }
 0xb72   :  { %v3103_v15 = vpop.eup %3102 }
 0xbd7   :  { %v905_v17 = vpop.permute.xlu0 %904 }
 0xbd8   :  { %v907_v18 = vmul.f32 %v3103_v15, %v905_v17  ;;  %v1489_v17 = vld [vmem:[#allocation9 + $0x8] sm:$0xff] }
 0xbda   :  { %909 = vst.msk [vmem:[#allocation3 + $0x20] sm:$0xff] %vm286_vm4, %v907_v18  ;;  %2585 = vmatmul.mubr.msk.f32.vlgmr.msra.gmra.mrb[10].mxu0 %vm286_vm4, %v907_v18  ;;  %v1491_v18 = vld [vmem:[#allocation9 + $0x18] sm:$0xff] }
 0xbdb   :  { %2778 = vmatpush1.bf16.msra.mxu0 %v3475_v14  ;;  %1127 = vmatprep.mubr.f32.mxu0 %v3335_v0 }
 0xbdc   :  { %2780 = vmatprep.subr.bf16.mxu0 %v3481_v16 }
 0xbdf   :  { %2782 = vmatpush1.bf16.msra.mxu0 %v3501_v22 }
 0xbe0   :  { %2784 = vmatprep.subr.bf16.mxu0 %v3504_v23 }
 0xbe1   :  { %v1301_v19 = vld [vmem:[#allocation3 + $0x20] sm:$0xff] }
 0xbe2   :  { %2598 = vmatmul.mubr.msk.f32.gmra.mrb[8].mxu1 %vm286_vm4, %v1301_v19  ;;  %v1488_v19 = vld [vmem:[#allocation9] sm:$0xff] }
 0xbe3   :  { %2786 = vmatpush1.bf16.msra.mxu0 %v3524_v29  ;;  %1451 = vmatprep.mubr.f32.mxu1 %v3335_v0 }
 0xbe4   :  { %2788 = vmatprep.subr.bf16.mxu0 %v3527_v30 }
 0xbe7   :  { %2790 = vmatpush1.bf16.msra.mxu0 %v3541_v34 }
 0xbe8   :  { %2792 = vmatprep.subr.bf16.mxu0 %v3467_v11 }
 0xcad   :  { %v1000_v20 = vpop.f32.mrb[10].mxu0 }
 0xcae   :  { %v1002_v21 = vpop.f32.mrb[11].mxu0  ;;  %v2979_v26 = vadd.f32 %v1000_v20, %v3593_v49  ;;  %v1490_v20 = vld [vmem:[#allocation9 + $0x10] sm:$0xff] }
 0xcaf   :  { %v2980_v24 = vadd.f32 %v1002_v21, %v3586_v43  ;;  %v1493_v21 = vld [vmem:[#allocation9 + $0x28] sm:$0xff] }
 0xcb0   :  { %v2586_v27 = vmul.f32 -1.442695, %v2979_v26  ;;  %v1492_v26 = vld [vmem:[#allocation9 + $0x20] sm:$0xff] }
 0xcb1   :  { %3104 = vtanh.f32 %v2980_v24  ;;  %v2587_v39 = vmul.f32 -1.442695, %v2980_v24  ;;  %v1495_v24 = vld [vmem:[#allocation9 + $0x38] sm:$0xff] }
 0xcb2   :  { %3106 = vpow2.f32 %v2586_v27  ;;  %v1494_v27 = vld [vmem:[#allocation9 + $0x30] sm:$0xff] }
 0xcbb   :  { %v3105_v25 = vpop.eup %3104 }
 0xcbc   :  { %1022 = vrot.lane.b32.xlu1 %v3105_v25, %s3337_s30  ;;  %v3107_v28 = vpop.eup %3106  ;;  %v3715_v25 = vpack.c.bf16 %v1490_v20, %v1488_v19 }
 0xcbd   :  { %v1013_v31 = vadd.f32 1.0, %v3107_v28  ;;  %v1497_v28 = vld [vmem:[#allocation9 + $0x48] sm:$0xff] }
 0xcbf   :  { %3108 = vrcp.f32 %v1013_v31  ;;  %v1499_v31 = vld [vmem:[#allocation9 + $0x58] sm:$0xff] }
 0xcc9   :  { %v3109_v32 = vpop.eup %3108 }
 0xcca   :  { %v1020_v11 = vmul.f32 %v3109_v32, %v901_v8 }
 0xd2e   :  { %v1023_v33 = vpop.permute.xlu1 %1022 }
 0xd2f   :  { %v1025_v35 = vmul.f32 %v3109_v32, %v1023_v33  ;;  %v3721_v32 = vpack.c.bf16 %v1494_v27, %v1492_v26  ;;  %v3724_v33 = vpack.c.bf16 %v1499_v31, %v1497_v28 }
 0xd31   :  { %1027 = vrot.lane.b32.xlu0 %v1025_v35, %s3337_s30 }
 0xda3   :  { %v1028_v36 = vpop.permute.xlu0 %1027 }
 0xda4   :  { %v1030_v37 = vadd.f32 %v1028_v36, %v1020_v11 }
 0xda6   :  { %3110 = vtanh.f32 %v1030_v37 }
 0xda7   :  { %3112 = vpow2.f32 %v2587_v39  ;;  %v1501_v39 = vld [vmem:[#allocation9 + $0x68] sm:$0xff] }
 0xdb0   :  { %v3111_v38 = vpop.eup %3110 }
 0xdb1   :  { %1033 = vrot.lane.b32.xlu1 %v3111_v38, %s3337_s30  ;;  %v3113_v42 = vpop.eup %3112  ;;  %v1498_v38 = vld [vmem:[#allocation9 + $0x50] sm:$0xff] }
 0xdb2   :  { %v1014_v44 = vadd.f32 1.0, %v3113_v42 }
 0xdb4   :  { %3114 = vrcp.f32 %v1014_v44  ;;  %v1503_v44 = vld [vmem:[#allocation9 + $0x78] sm:$0xff] }
 0xdbe   :  { %v3115_v45 = vpop.eup %3114 }
 0xe23   :  { %v1034_v46 = vpop.permute.xlu1 %1033 }
 0xe24   :  { %v1036_v47 = vmul.f32 %v3115_v45, %v1034_v46  ;;  %v1500_v45 = vld [vmem:[#allocation9 + $0x60] sm:$0xff]  ;;  %v1502_v46 = vld [vmem:[#allocation9 + $0x70] sm:$0xff] }
 0xe26   :  { %1038 = vst.msk [vmem:[#allocation3 + $0x28] sm:$0xff] %vm286_vm4, %v1036_v47  ;;  %2588 = vmatmul.mubr.msk.f32.vlgmr.msra.gmra.mrb[12].mxu0 %vm286_vm4, %v1036_v47  ;;  %v3730_v47 = vpack.c.bf16 %v1503_v44, %v1501_v39 }
 0xe27   :  { %2794 = vmatpush1.bf16.msra.mxu0 %v3475_v14  ;;  %1256 = vmatprep.mubr.f32.mxu0 %v3335_v0 }
 0xe28   :  { %2796 = vmatprep.subr.bf16.mxu0 %v3481_v16 }
 0xe2b   :  { %2798 = vmatpush1.bf16.msra.mxu0 %v3501_v22 }
 0xe2c   :  { %2800 = vmatprep.subr.bf16.mxu0 %v3504_v23 }
 0xe2d   :  { %v1302_v50 = vld [vmem:[#allocation3 + $0x28] sm:$0xff] }
 0xe2e   :  { %2599 = vmatmul.mubr.msk.f32.gmra.mrb[10].mxu1 %vm286_vm4, %v1302_v50  ;;  %v3733_v50 = vpack.c.bf16 %v1502_v46, %v1500_v45 }
 0xe2f   :  { %2802 = vmatpush1.bf16.msra.mxu0 %v3524_v29  ;;  %1457 = vmatprep.mubr.f32.mxu1 %v3335_v0 }
 0xe30   :  { %2804 = vmatprep.subr.bf16.mxu0 %v3527_v30 }
 0xe33   :  { %2806 = vmatpush1.bf16.msra.mxu0 %v3541_v34 }
 0xef9   :  { %v1129_v14 = vpop.f32.mrb[12].mxu0 }
 0xefa   :  { %v1131_v51 = vpop.f32.mrb[13].mxu0  ;;  %v2981_v22 = vadd.f32 %v1129_v14, %v3593_v49 }
 0xefb   :  { %v2982_v52 = vadd.f32 %v1131_v51, %v3586_v43 }
 0xefc   :  { %v2589_v23 = vmul.f32 -1.442695, %v2981_v22 }
 0xefd   :  { %3116 = vtanh.f32 %v2982_v52  ;;  %v2590_v59 = vmul.f32 -1.442695, %v2982_v52 }
 0xefe   :  { %3118 = vpow2.f32 %v2589_v23 }
 0xf07   :  { %v3117_v16 = vpop.eup %3116 }
 0xf08   :  { %1151 = vrot.lane.b32.xlu0 %v3117_v16, %s3337_s30  ;;  %v3119_v53 = vpop.eup %3118 }
 0xf09   :  { %v1142_v29 = vadd.f32 1.0, %v3119_v53 }
 0xf0b   :  { %3120 = vrcp.f32 %v1142_v29 }
 0xf15   :  { %v3121_v54 = vpop.eup %3120 }
 0xf16   :  { %v1149_v34 = vmul.f32 %v3121_v54, %v1030_v37  ;;  %v1496_v37 = vld [vmem:[#allocation9 + $0x40] sm:$0xff] }
 0xf17   :  { %v3728_v42 = vpack.c.bf16 %v1498_v38, %v1496_v37 }
 0xf7a   :  { %v1152_v55 = vpop.permute.xlu0 %1151 }
 0xf7b   :  { %v1154_v30 = vmul.f32 %v3121_v54, %v1152_v55  ;;  %v1321_v54 = vld [vmem:[%s3926_s6] sm:$0x3] }
 0xf7c   :  { %v3757_v55 = vrot.slane %v1321_v54, %v100_v41 }
 0xf7d   :  { %1156 = vrot.lane.b32.xlu1 %v1154_v30, %s3337_s30 }
 0xfef   :  { %v1157_v56 = vpop.permute.xlu1 %1156 }
 0xff0   :  { %v1159_v57 = vadd.f32 %v1157_v56, %v1149_v34 }
 0xff2   :  { %3122 = vtanh.f32 %v1159_v57 }
 0xff3   :  { %3124 = vpow2.f32 %v2590_v59 }
 0xffc   :  { %v3123_v58 = vpop.eup %3122 }
 0xffd   :  { %1162 = vrot.lane.b32.xlu0 %v3123_v58, %s3337_s30  ;;  %v3125_v60 = vpop.eup %3124  ;;  %v3763_v58 = vrot.slane %v1321_v54, %v96_v48 }
 0xffe   :  { %v1143_v61 = vadd.f32 1.0, %v3125_v60 }
0x1000   :  { %3126 = vrcp.f32 %v1143_v61 }
0x100a   :  { %v3127_v62 = vpop.eup %3126 }
0x106f   :  { %v1163_v63 = vpop.permute.xlu0 %1162 }
0x1070   :  { %v1165_v1 = vmul.f32 %v3127_v62, %v1163_v63 }
0x1072   :  { %1167 = vst.msk [vmem:[#allocation3 + $0x30] sm:$0xff] %vm286_vm4, %v1165_v1  ;;  %2591 = vmatmul.mubr.msk.f32.vlgmr.msra.gmra.mrb[14].mxu0 %vm286_vm4, %v1165_v1 }
0x1073   :  { %2659 = vmatprep.mubr.msk.f32.mxu0 %vm3339_vm5, %v3335_v0 }
0x1079   :  { %v1303_v2 = vld [vmem:[#allocation3 + $0x30] sm:$0xff] }
0x107a   :  { %2600 = vmatmul.mubr.msk.f32.gmra.mrb[12].mxu1 %vm286_vm4, %v1303_v2 }
0x107b   :  { %1463 = vmatprep.mubr.f32.mxu1 %v3335_v0 }
0x1145   :  { %v1258_v3 = vpop.f32.mrb[14].mxu0 }
0x1146   :  { %v1260_v4 = vpop.f32.mrb[15].mxu0  ;;  %v2983_v7 = vadd.f32 %v1258_v3, %v3593_v49  ;;  %v3717_v49 = vpack.c.bf16 %v1495_v24, %v1493_v21 }
0x1147   :  { %v2984_v5 = vadd.f32 %v1260_v4, %v3586_v43  ;;  %v3713_v43 = vpack.c.bf16 %v1491_v18, %v1489_v17 }
0x1148   :  { %v2592_v8 = vmul.f32 -1.442695, %v2983_v7 }
0x1149   :  { %3128 = vtanh.f32 %v2984_v5  ;;  %2824 = vmatprep.subr.bf16.mxu1 %v3713_v43  ;;  %v2593_v51 = vmul.f32 -1.442695, %v2984_v5 }
0x114a   :  { %3130 = vpow2.f32 %v2592_v8  ;;  %2826 = vmatpush1.bf16.msra.mxu1 %v3715_v25 }
0x114b   :  { %2828 = vmatprep.subr.bf16.mxu1 %v3717_v49 }
0x114e   :  { %2830 = vmatpush1.bf16.msra.mxu1 %v3721_v32 }
0x114f   :  { %2832 = vmatprep.subr.bf16.mxu1 %v3724_v33 }
0x1152   :  { %2834 = vmatpush1.bf16.msra.mxu1 %v3728_v42 }
0x1153   :  { %v3129_v6 = vpop.eup %3128  ;;  %2836 = vmatprep.subr.bf16.mxu1 %v3730_v47 }
0x1154   :  { %1280 = vrot.lane.b32.xlu1 %v3129_v6, %s3337_s30  ;;  %v3131_v9 = vpop.eup %3130 }
0x1155   :  { %v1271_v10 = vadd.f32 1.0, %v3131_v9 }
0x1156   :  { %2838 = vmatpush1.bf16.msra.mxu1 %v3733_v50 }
0x1157   :  { %3132 = vrcp.f32 %v1271_v10  ;;  %2840 = vmatprep.subr.bf16.mxu1 %v3713_v43 }
0x1161   :  { %v3133_v12 = vpop.eup %3132 }
0x1162   :  { %v1278_v35 = vmul.f32 %v3133_v12, %v1159_v57 }
0x11c6   :  { %v1281_v13 = vpop.permute.xlu1 %1280 }
0x11c7   :  { %v1283_v15 = vmul.f32 %v3133_v12, %v1281_v13 }
0x11c9   :  { %1285 = vrot.lane.b32.xlu0 %v1283_v15, %s3337_s30 }
0x123b   :  { %v1286_v11 = vpop.permute.xlu0 %1285 }
0x123c   :  { %v1288_v36 = vadd.f32 %v1286_v11, %v1278_v35 }
0x123e   :  { %3134 = vtanh.f32 %v1288_v36 }
0x123f   :  { %3136 = vpow2.f32 %v2593_v51 }
0x1248   :  { %v3135_v14 = vpop.eup %3134 }
0x1249   :  { %1291 = vrot.lane.b32.xlu1 %v3135_v14, %s3337_s30  ;;  %v3137_v52 = vpop.eup %3136 }
0x124a   :  { %v1272_v16 = vadd.f32 1.0, %v3137_v52 }
0x124c   :  { %3138 = vrcp.f32 %v1272_v16 }
0x1256   :  { %v3139_v22 = vpop.eup %3138 }
0x12bb   :  { %v1292_v23 = vpop.permute.xlu1 %1291 }
0x12bc   :  { %v1294_v53 = vmul.f32 %v3139_v22, %v1292_v23 }
0x12be   :  { %1296 = vst.msk [vmem:[#allocation3 + $0x38] sm:$0xff] %vm286_vm4, %v1294_v53 }
0x12c5   :  { %v1304_v29 = vld [vmem:[#allocation3 + $0x38] sm:$0xff] }
0x12c6   :  { %2601 = vmatmul.mubr.msk.f32.gmra.mrb[14].mxu1 %vm286_vm4, %v1304_v29 }
0x12c7   :  { %1568 = vmatprep.mubr.f32.mxu1 %v3335_v0 }
0x12ca   :  { %1569 = vmatmul.mubr.f32.vlgmr.msra.gmra.mrb[0].mxu1 %v3335_v0 }
0x12cb   :  { %2842 = vmatpush1.bf16.msra.mxu1 %v3715_v25  ;;  %1676 = vmatprep.mubr.f32.mxu1 %v3335_v0 }
0x12cc   :  { %2844 = vmatprep.subr.bf16.mxu1 %v3717_v49 }
0x12cf   :  { %2846 = vmatpush1.bf16.msra.mxu1 %v3721_v32 }
0x12d0   :  { %2848 = vmatprep.subr.bf16.mxu1 %v3724_v33 }
0x12d3   :  { %2850 = vmatpush1.bf16.msra.mxu1 %v3728_v42 }
0x12d4   :  { %2852 = vmatprep.subr.bf16.mxu1 %v3730_v47 }
0x12d7   :  { %2854 = vmatpush1.bf16.msra.mxu1 %v3733_v50 }
0x12d8   :  { %2856 = vmatprep.subr.bf16.mxu1 %v3713_v43 }
0x139d   :  { %v1570_v30 = vpop.f32.mrb[0].mxu1 }
0x139e   :  { %v1572_v34 = vpop.f32.mrb[1].mxu1  ;;  %v2985_v59 = vadd.f32 %v1570_v30, %v3763_v58 }
0x139f   :  { %v2986_v56 = vadd.f32 %v1572_v34, %v3757_v55 }
0x13a0   :  { %v2602_v60 = vmul.f32 -1.442695, %v2985_v59 }
0x13a1   :  { %3140 = vtanh.f32 %v2986_v56  ;;  %v2603_v40 = vmul.f32 -1.442695, %v2986_v56 }
0x13a2   :  { %3142 = vpow2.f32 %v2602_v60 }
0x13ab   :  { %v3141_v57 = vpop.eup %3140 }
0x13ac   :  { %1592 = vrot.lane.b32.xlu0 %v3141_v57, %s3337_s30  ;;  %v3143_v61 = vpop.eup %3142 }
0x13ad   :  { %v1583_v62 = vadd.f32 1.0, %v3143_v61 }
0x13af   :  { %3144 = vrcp.f32 %v1583_v62 }
0x13b9   :  { %v3145_v41 = vpop.eup %3144 }
0x13ba   :  { %v1590_v2 = vmul.f32 0.0, %v3145_v41 }
0x141e   :  { %v1593_v63 = vpop.permute.xlu0 %1592 }
0x141f   :  { %v1595_v1 = vmul.f32 %v3145_v41, %v1593_v63 }
0x1421   :  { %1597 = vrot.lane.b32.xlu1 %v1595_v1, %s3337_s30 }
0x1493   :  { %v1598_v3 = vpop.permute.xlu1 %1597 }
0x1494   :  { %v1600_v4 = vadd.f32 %v1598_v3, %v1590_v2 }
0x1496   :  { %3146 = vtanh.f32 %v1600_v4 }
0x1497   :  { %3148 = vpow2.f32 %v2603_v40 }
0x14a0   :  { %v3147_v5 = vpop.eup %3146 }
0x14a1   :  { %1603 = vrot.lane.b32.xlu0 %v3147_v5, %s3337_s30  ;;  %v3149_v48 = vpop.eup %3148 }
0x14a2   :  { %v1584_v6 = vadd.f32 1.0, %v3149_v48 }
0x14a4   :  { %3150 = vrcp.f32 %v1584_v6 }
0x14ae   :  { %v3151_v7 = vpop.eup %3150 }
0x1513   :  { %v1604_v8 = vpop.permute.xlu0 %1603 }
0x1514   :  { %v1606_v9 = vmul.f32 %v3151_v7, %v1604_v8 }
0x1516   :  { %2604 = vmatmul.mubr.msk.f32.vlgmr.msra.gmra.mrb[2].mxu1 %vm286_vm4, %v1606_v9 }
0x1517   :  { %2858 = vmatpush1.bf16.msra.mxu1 %v3715_v25  ;;  %1784 = vmatprep.mubr.f32.mxu1 %v3335_v0 }
0x1518   :  { %2860 = vmatprep.subr.bf16.mxu1 %v3717_v49 }
0x151b   :  { %2862 = vmatpush1.bf16.msra.mxu1 %v3721_v32 }
0x151c   :  { %2864 = vmatprep.subr.bf16.mxu1 %v3724_v33 }
0x151f   :  { %2866 = vmatpush1.bf16.msra.mxu1 %v3728_v42 }
0x1520   :  { %2868 = vmatprep.subr.bf16.mxu1 %v3730_v47 }
0x1523   :  { %2870 = vmatpush1.bf16.msra.mxu1 %v3733_v50 }
0x1524   :  { %2872 = vmatprep.subr.bf16.mxu1 %v3713_v43 }
0x15e9   :  { %v1678_v10 = vpop.f32.mrb[2].mxu1 }
0x15ea   :  { %v1680_v12 = vpop.f32.mrb[3].mxu1  ;;  %v2987_v17 = vadd.f32 %v1678_v10, %v3763_v58 }
0x15eb   :  { %v2988_v13 = vadd.f32 %v1680_v12, %v3757_v55 }
0x15ec   :  { %v2605_v18 = vmul.f32 -1.442695, %v2987_v17 }
0x15ed   :  { %3152 = vtanh.f32 %v2988_v13  ;;  %v2606_v11 = vmul.f32 -1.442695, %v2988_v13 }
0x15ee   :  { %3154 = vpow2.f32 %v2605_v18 }
0x15f7   :  { %v3153_v15 = vpop.eup %3152 }
0x15f8   :  { %1700 = vrot.lane.b32.xlu1 %v3153_v15, %s3337_s30  ;;  %v3155_v19 = vpop.eup %3154 }
0x15f9   :  { %v1691_v20 = vadd.f32 1.0, %v3155_v19 }
0x15fb   :  { %3156 = vrcp.f32 %v1691_v20 }
0x1605   :  { %v3157_v21 = vpop.eup %3156 }
0x1606   :  { %v1698_v27 = vmul.f32 %v3157_v21, %v1600_v4 }
0x166a   :  { %v1701_v24 = vpop.permute.xlu1 %1700 }
0x166b   :  { %v1703_v26 = vmul.f32 %v3157_v21, %v1701_v24 }
0x166d   :  { %1705 = vrot.lane.b32.xlu0 %v1703_v26, %s3337_s30 }
0x16df   :  { %v1706_v28 = vpop.permute.xlu0 %1705 }
0x16e0   :  { %v1708_v31 = vadd.f32 %v1706_v28, %v1698_v27 }
0x16e2   :  { %3158 = vtanh.f32 %v1708_v31 }
0x16e3   :  { %3160 = vpow2.f32 %v2606_v11 }
0x16ec   :  { %v3159_v35 = vpop.eup %3158 }
0x16ed   :  { %1711 = vrot.lane.b32.xlu1 %v3159_v35, %s3337_s30  ;;  %v3161_v36 = vpop.eup %3160 }
0x16ee   :  { %v1692_v37 = vadd.f32 1.0, %v3161_v36 }
0x16f0   :  { %3162 = vrcp.f32 %v1692_v37 }
0x16fa   :  { %v3163_v38 = vpop.eup %3162 }
0x175f   :  { %v1712_v39 = vpop.permute.xlu1 %1711 }
0x1760   :  { %v1714_v44 = vmul.f32 %v3163_v38, %v1712_v39 }
0x1762   :  { %2607 = vmatmul.mubr.msk.f32.vlgmr.msra.gmra.mrb[4].mxu1 %vm286_vm4, %v1714_v44 }
0x1763   :  { %2874 = vmatpush1.bf16.msra.mxu1 %v3715_v25  ;;  %1892 = vmatprep.mubr.f32.mxu1 %v3335_v0 }
0x1764   :  { %2876 = vmatprep.subr.bf16.mxu1 %v3717_v49 }
0x1767   :  { %2878 = vmatpush1.bf16.msra.mxu1 %v3721_v32 }
0x1768   :  { %2880 = vmatprep.subr.bf16.mxu1 %v3724_v33 }
0x176b   :  { %2882 = vmatpush1.bf16.msra.mxu1 %v3728_v42 }
0x176c   :  { %2884 = vmatprep.subr.bf16.mxu1 %v3730_v47 }
0x176f   :  { %2886 = vmatpush1.bf16.msra.mxu1 %v3733_v50 }
0x1770   :  { %2888 = vmatprep.subr.bf16.mxu1 %v3713_v43 }
0x1835   :  { %v1786_v45 = vpop.f32.mrb[4].mxu1 }
0x1836   :  { %v1788_v46 = vpop.f32.mrb[5].mxu1  ;;  %v2989_v52 = vadd.f32 %v1786_v45, %v3763_v58 }
0x1837   :  { %v2990_v14 = vadd.f32 %v1788_v46, %v3757_v55 }
0x1838   :  { %v2608_v16 = vmul.f32 -1.442695, %v2989_v52 }
0x1839   :  { %3164 = vtanh.f32 %v2990_v14  ;;  %v2609_v59 = vmul.f32 -1.442695, %v2990_v14 }
0x183a   :  { %3166 = vpow2.f32 %v2608_v16 }
0x1843   :  { %v3165_v51 = vpop.eup %3164 }
0x1844   :  { %1808 = vrot.lane.b32.xlu0 %v3165_v51, %s3337_s30  ;;  %v3167_v22 = vpop.eup %3166 }
0x1845   :  { %v1799_v23 = vadd.f32 1.0, %v3167_v22 }
0x1847   :  { %3168 = vrcp.f32 %v1799_v23 }
0x1851   :  { %v3169_v53 = vpop.eup %3168 }
0x1852   :  { %v1806_v30 = vmul.f32 %v3169_v53, %v1708_v31 }
0x18b6   :  { %v1809_v29 = vpop.permute.xlu0 %1808 }
0x18b7   :  { %v1811_v54 = vmul.f32 %v3169_v53, %v1809_v29 }
0x18b9   :  { %1813 = vrot.lane.b32.xlu1 %v1811_v54, %s3337_s30 }
0x192b   :  { %v1814_v34 = vpop.permute.xlu1 %1813 }
0x192c   :  { %v1816_v56 = vadd.f32 %v1814_v34, %v1806_v30 }
0x192e   :  { %3170 = vtanh.f32 %v1816_v56 }
0x192f   :  { %3172 = vpow2.f32 %v2609_v59 }
0x1938   :  { %v3171_v57 = vpop.eup %3170 }
0x1939   :  { %1819 = vrot.lane.b32.xlu0 %v3171_v57, %s3337_s30  ;;  %v3173_v60 = vpop.eup %3172 }
0x193a   :  { %v1800_v61 = vadd.f32 1.0, %v3173_v60 }
0x193c   :  { %3174 = vrcp.f32 %v1800_v61 }
0x1946   :  { %v3175_v62 = vpop.eup %3174 }
0x19ab   :  { %v1820_v41 = vpop.permute.xlu0 %1819 }
0x19ac   :  { %v1822_v63 = vmul.f32 %v3175_v62, %v1820_v41 }
0x19ae   :  { %2610 = vmatmul.mubr.msk.f32.vlgmr.msra.gmra.mrb[6].mxu1 %vm286_vm4, %v1822_v63 }
0x19af   :  { %2890 = vmatpush1.bf16.msra.mxu1 %v3715_v25  ;;  %2000 = vmatprep.mubr.f32.mxu1 %v3335_v0 }
0x19b0   :  { %2892 = vmatprep.subr.bf16.mxu1 %v3717_v49 }
0x19b3   :  { %2894 = vmatpush1.bf16.msra.mxu1 %v3721_v32 }
0x19b4   :  { %2896 = vmatprep.subr.bf16.mxu1 %v3724_v33 }
0x19b7   :  { %2898 = vmatpush1.bf16.msra.mxu1 %v3728_v42 }
0x19b8   :  { %2900 = vmatprep.subr.bf16.mxu1 %v3730_v47 }
0x19bb   :  { %2902 = vmatpush1.bf16.msra.mxu1 %v3733_v50 }
0x19bc   :  { %2904 = vmatprep.subr.bf16.mxu1 %v3713_v43 }
0x1a81   :  { %v1894_v1 = vpop.f32.mrb[6].mxu1 }
0x1a82   :  { %v1896_v2 = vpop.f32.mrb[7].mxu1  ;;  %v2991_v5 = vadd.f32 %v1894_v1, %v3763_v58 }
0x1a83   :  { %v2992_v3 = vadd.f32 %v1896_v2, %v3757_v55 }
0x1a84   :  { %v2611_v40 = vmul.f32 -1.442695, %v2991_v5 }
0x1a85   :  { %3176 = vtanh.f32 %v2992_v3  ;;  %v2612_v17 = vmul.f32 -1.442695, %v2992_v3 }
0x1a86   :  { %3178 = vpow2.f32 %v2611_v40 }
0x1a8f   :  { %v3177_v4 = vpop.eup %3176 }
0x1a90   :  { %1916 = vrot.lane.b32.xlu1 %v3177_v4, %s3337_s30  ;;  %v3179_v48 = vpop.eup %3178 }
0x1a91   :  { %v1907_v6 = vadd.f32 1.0, %v3179_v48 }
0x1a93   :  { %3180 = vrcp.f32 %v1907_v6 }
0x1a9d   :  { %v3181_v7 = vpop.eup %3180 }
0x1a9e   :  { %v1914_v10 = vmul.f32 %v3181_v7, %v1816_v56 }
0x1b02   :  { %v1917_v8 = vpop.permute.xlu1 %1916 }
0x1b03   :  { %v1919_v9 = vmul.f32 %v3181_v7, %v1917_v8 }
0x1b05   :  { %1921 = vrot.lane.b32.xlu0 %v1919_v9, %s3337_s30 }
0x1b77   :  { %v1922_v12 = vpop.permute.xlu0 %1921 }
0x1b78   :  { %v1924_v13 = vadd.f32 %v1922_v12, %v1914_v10 }
0x1b7a   :  { %3182 = vtanh.f32 %v1924_v13 }
0x1b7b   :  { %3184 = vpow2.f32 %v2612_v17 }
0x1b84   :  { %v3183_v15 = vpop.eup %3182 }
0x1b85   :  { %1927 = vrot.lane.b32.xlu1 %v3183_v15, %s3337_s30  ;;  %v3185_v18 = vpop.eup %3184 }
0x1b86   :  { %v1908_v19 = vadd.f32 1.0, %v3185_v18 }
0x1b88   :  { %3186 = vrcp.f32 %v1908_v19 }
0x1b92   :  { %v3187_v20 = vpop.eup %3186 }
0x1bf7   :  { %v1928_v21 = vpop.permute.xlu1 %1927 }
0x1bf8   :  { %v1930_v24 = vmul.f32 %v3187_v20, %v1928_v21 }
0x1bfa   :  { %2613 = vmatmul.mubr.msk.f32.vlgmr.msra.gmra.mrb[8].mxu1 %vm286_vm4, %v1930_v24 }
0x1bfb   :  { %2906 = vmatpush1.bf16.msra.mxu1 %v3715_v25  ;;  %2108 = vmatprep.mubr.f32.mxu1 %v3335_v0 }
0x1bfc   :  { %2908 = vmatprep.subr.bf16.mxu1 %v3717_v49 }
0x1bff   :  { %2910 = vmatpush1.bf16.msra.mxu1 %v3721_v32 }
0x1c00   :  { %2912 = vmatprep.subr.bf16.mxu1 %v3724_v33 }
0x1c03   :  { %2914 = vmatpush1.bf16.msra.mxu1 %v3728_v42 }
0x1c04   :  { %2916 = vmatprep.subr.bf16.mxu1 %v3730_v47 }
0x1c07   :  { %2918 = vmatpush1.bf16.msra.mxu1 %v3733_v50 }
0x1c08   :  { %2920 = vmatprep.subr.bf16.mxu1 %v3713_v43 }
0x1ccd   :  { %v2002_v26 = vpop.f32.mrb[8].mxu1 }
0x1cce   :  { %v2004_v27 = vpop.f32.mrb[9].mxu1  ;;  %v2993_v35 = vadd.f32 %v2002_v26, %v3763_v58 }
0x1ccf   :  { %v2994_v28 = vadd.f32 %v2004_v27, %v3757_v55 }
0x1cd0   :  { %v2614_v11 = vmul.f32 -1.442695, %v2993_v35 }
0x1cd1   :  { %3188 = vtanh.f32 %v2994_v28  ;;  %v2615_v52 = vmul.f32 -1.442695, %v2994_v28 }
0x1cd2   :  { %3190 = vpow2.f32 %v2614_v11 }
0x1cdb   :  { %v3189_v31 = vpop.eup %3188 }
0x1cdc   :  { %2024 = vrot.lane.b32.xlu0 %v3189_v31, %s3337_s30  ;;  %v3191_v36 = vpop.eup %3190 }
0x1cdd   :  { %v2015_v37 = vadd.f32 1.0, %v3191_v36 }
0x1cdf   :  { %3192 = vrcp.f32 %v2015_v37 }
0x1ce9   :  { %v3193_v38 = vpop.eup %3192 }
0x1cea   :  { %v2022_v45 = vmul.f32 %v3193_v38, %v1924_v13 }
0x1d4e   :  { %v2025_v39 = vpop.permute.xlu0 %2024 }
0x1d4f   :  { %v2027_v44 = vmul.f32 %v3193_v38, %v2025_v39 }
0x1d51   :  { %2029 = vrot.lane.b32.xlu1 %v2027_v44, %s3337_s30 }
0x1dc3   :  { %v2030_v46 = vpop.permute.xlu1 %2029 }
0x1dc4   :  { %v2032_v14 = vadd.f32 %v2030_v46, %v2022_v45 }
0x1dc6   :  { %3194 = vtanh.f32 %v2032_v14 }
0x1dc7   :  { %3196 = vpow2.f32 %v2615_v52 }
0x1dd0   :  { %v3195_v51 = vpop.eup %3194 }
0x1dd1   :  { %2035 = vrot.lane.b32.xlu0 %v3195_v51, %s3337_s30  ;;  %v3197_v16 = vpop.eup %3196  ;;  %v3338_v51 = vmov 0.0|0.0  }
0x1dd2   :  { %v2016_v22 = vadd.f32 1.0, %v3197_v16  ;;  %2951 = vmatprep.subr.bf16.mxu0 %v3338_v51  ;;  %v2366_v16 = vld [vmem:[%s3927_s7 + $0x18] sm:$0xff] }
0x1dd4   :  { %3198 = vrcp.f32 %v2016_v22 }
0x1dde   :  { %v3199_v23 = vpop.eup %3198 }
0x1e43   :  { %v2036_v53 = vpop.permute.xlu0 %2035 }
0x1e44   :  { %v2038_v29 = vmul.f32 %v3199_v23, %v2036_v53  ;;  %v2367_v23 = vld [vmem:[%s3927_s7 + $0x20] sm:$0xff]  ;;  %v2368_v53 = vld [vmem:[%s3927_s7 + $0x28] sm:$0xff] }
0x1e46   :  { %2616 = vmatmul.mubr.msk.f32.vlgmr.msra.gmra.mrb[10].mxu1 %vm286_vm4, %v2038_v29  ;;  %v2958_v29 = vpack.c.bf16 %v2368_v53, %v2367_v23 }
0x1e47   :  { %2922 = vmatpush1.bf16.msra.mxu1 %v3715_v25  ;;  %2216 = vmatprep.mubr.f32.mxu1 %v3335_v0 }
0x1e48   :  { %2924 = vmatprep.subr.bf16.mxu1 %v3717_v49 }
0x1e4b   :  { %2926 = vmatpush1.bf16.msra.mxu1 %v3721_v32 }
0x1e4c   :  { %2928 = vmatprep.subr.bf16.mxu1 %v3724_v33 }
0x1e4f   :  { %2930 = vmatpush1.bf16.msra.mxu1 %v3728_v42 }
0x1e50   :  { %2932 = vmatprep.subr.bf16.mxu1 %v3730_v47 }
0x1e53   :  { %2934 = vmatpush1.bf16.msra.mxu1 %v3733_v50 }
0x1e54   :  { %2936 = vmatprep.subr.bf16.mxu1 %v3713_v43 }
0x1f19   :  { %v2110_v54 = vpop.f32.mrb[10].mxu1 }
0x1f1a   :  { %v2112_v30 = vpop.f32.mrb[11].mxu1  ;;  %v2995_v57 = vadd.f32 %v2110_v54, %v3763_v58  ;;  %v2369_v54 = vld [vmem:[%s3927_s7 + $0x30] sm:$0xff] }
0x1f1b   :  { %v2996_v34 = vadd.f32 %v2112_v30, %v3757_v55  ;;  %v2370_v30 = vld [vmem:[%s3927_s7 + $0x38] sm:$0xff] }
0x1f1c   :  { %v2617_v59 = vmul.f32 -1.442695, %v2995_v57 }
0x1f1d   :  { %3200 = vtanh.f32 %v2996_v34  ;;  %v2618_v4 = vmul.f32 -1.442695, %v2996_v34  ;;  %v2961_v34 = vpack.c.bf16 %v2370_v30, %v2369_v54 }
0x1f1e   :  { %3202 = vpow2.f32 %v2617_v59 }
0x1f27   :  { %v3201_v56 = vpop.eup %3200 }
0x1f28   :  { %2132 = vrot.lane.b32.xlu1 %v3201_v56, %s3337_s30  ;;  %v3203_v60 = vpop.eup %3202 }
0x1f29   :  { %v2123_v61 = vadd.f32 1.0, %v3203_v60  ;;  %v2452_v60 = vld [vmem:[%s3929_s9] sm:$0xff] }
0x1f2b   :  { %3204 = vrcp.f32 %v2123_v61  ;;  %v2453_v61 = vld [vmem:[%s3929_s9 + $0x8] sm:$0xff] }
0x1f35   :  { %v3205_v62 = vpop.eup %3204 }
0x1f36   :  { %v2130_v43 = vmul.f32 %v3205_v62, %v2032_v14  ;;  %v2364_v14 = vld [vmem:[%s3927_s7 + $0x8] sm:$0xff] }
0x1f9a   :  { %v2133_v41 = vpop.permute.xlu1 %2132 }
0x1f9b   :  { %v2135_v63 = vmul.f32 %v3205_v62, %v2133_v41  ;;  %v2964_v62 = vpack.c.bf16 %v2453_v61, %v2452_v60 }
0x1f9d   :  { %2137 = vrot.lane.b32.xlu0 %v2135_v63, %s3337_s30 }
0x200f   :  { %v2138_v1 = vpop.permute.xlu0 %2137 }
0x2010   :  { %v2140_v2 = vadd.f32 %v2138_v1, %v2130_v43 }
0x2012   :  { %3206 = vtanh.f32 %v2140_v2 }
0x2013   :  { %3208 = vpow2.f32 %v2618_v4  ;;  %v2454_v4 = vld [vmem:[%s3929_s9 + $0x10] sm:$0xff] }
0x201c   :  { %v3207_v3 = vpop.eup %3206 }
0x201d   :  { %2143 = vrot.lane.b32.xlu1 %v3207_v3, %s3337_s30  ;;  %v3209_v5 = vpop.eup %3208 }
0x201e   :  { %v2124_v40 = vadd.f32 1.0, %v3209_v5  ;;  %v2455_v5 = vld [vmem:[%s3929_s9 + $0x18] sm:$0xff]  ;;  %s3302_s9 = scalar_lea.vmem %s2545_s23, 128 }
0x201f   :  { %p3303_p10 = scmp.ne.s32.totalorder %s2545_s23, %s3302_s9  ;;  %p3308_p12 = scmp.lt.s32.totalorder %s3302_s9, %s3302_s9 }
0x2020   :  { %3210 = vrcp.f32 %v2124_v40  ;;  %v2967_v40 = vpack.c.bf16 %v2455_v5, %v2454_v4 }
0x2021   :  { %p3309_p13 = por %p3308_p12, %p3307_p11 }
0x2023   :  { %p3310_p0 = pnand %p3309_p13, %p3303_p10 }
0x202a   :  { %v3211_v48 = vpop.eup %3210 }
0x208f   :  { %v2144_v6 = vpop.permute.xlu1 %2143 }
0x2090   :  { %v2146_v7 = vmul.f32 %v3211_v48, %v2144_v6  ;;  %v2625_v48 = vld [vmem:[%s3928_s8] ss:$0 sm:$0xff] }
0x2092   :  { %2619 = vmatmul.mubr.msk.f32.vlgmr.msra.gmra.mrb[12].mxu1 %vm286_vm4, %v2146_v7 }
0x2093   :  { %2938 = vmatpush1.bf16.msra.mxu1 %v3715_v25  ;;  %2324 = vmatprep.mubr.f32.mxu1 %v3335_v0 }
0x2094   :  { %2940 = vmatprep.subr.bf16.mxu1 %v3717_v49 }
0x2097   :  { %2942 = vmatpush1.bf16.msra.mxu1 %v3721_v32 }
0x2098   :  { %2944 = vmatprep.subr.bf16.mxu1 %v3724_v33 }
0x209b   :  { %2946 = vmatpush1.bf16.msra.mxu1 %v3728_v42 }
0x209c   :  { %2948 = vmatprep.subr.bf16.mxu1 %v3730_v47 }
0x209f   :  { %2950 = vmatpush1.bf16.msra.mxu1 %v3733_v50 }
0x20a0   :  { %2963 = vmatprep.subr.bf16.mxu1 %v3338_v51 }
0x2165   :  { %v2218_v8 = vpop.f32.mrb[12].mxu1 }
0x2166   :  { %v2220_v9 = vpop.f32.mrb[13].mxu1  ;;  %v2997_v49 = vadd.f32 %v2218_v8, %v3763_v58 }
0x2167   :  { %v2998_v10 = vadd.f32 %v2220_v9, %v3757_v55 }
0x2168   :  { %v2620_v12 = vmul.f32 -1.442695, %v2997_v49 }
0x2169   :  { %3212 = vtanh.f32 %v2998_v10  ;;  %v2621_v19 = vmul.f32 -1.442695, %v2998_v10  ;;  %v2627_v10 = vld [vmem:[%s3930_s10] ss:$0 sm:$0xff] }
0x216a   :  { %3214 = vpow2.f32 %v2620_v12 }
0x2173   :  { %v3213_v25 = vpop.eup %3212 }
0x2174   :  { %2240 = vrot.lane.b32.xlu0 %v3213_v25, %s3337_s30  ;;  %v3215_v32 = vpop.eup %3214 }
0x2175   :  { %v2231_v33 = vadd.f32 1.0, %v3215_v32 }
0x2177   :  { %3216 = vrcp.f32 %v2231_v33 }
0x2181   :  { %v3217_v42 = vpop.eup %3216 }
0x2182   :  { %v2238_v50 = vmul.f32 %v3217_v42, %v2140_v2 }
0x21e6   :  { %v2241_v13 = vpop.permute.xlu0 %2240 }
0x21e7   :  { %v2243_v47 = vmul.f32 %v3217_v42, %v2241_v13 }
0x21e9   :  { %2245 = vrot.lane.b32.xlu1 %v2243_v47, %s3337_s30 }
0x225b   :  { %v2246_v15 = vpop.permute.xlu1 %2245 }
0x225c   :  { %v2248_v17 = vadd.f32 %v2246_v15, %v2238_v50 }
0x225e   :  { %3218 = vtanh.f32 %v2248_v17 }
0x225f   :  { %3220 = vpow2.f32 %v2621_v19 }
0x2268   :  { %v3219_v18 = vpop.eup %3218 }
0x2269   :  { %2251 = vrot.lane.b32.xlu0 %v3219_v18, %s3337_s30  ;;  %v3221_v20 = vpop.eup %3220 }
0x226a   :  { %v2232_v21 = vadd.f32 1.0, %v3221_v20 }
0x226c   :  { %3222 = vrcp.f32 %v2232_v21 }
0x2276   :  { %v3223_v24 = vpop.eup %3222 }
0x22db   :  { %v2252_v26 = vpop.permute.xlu0 %2251 }
0x22dc   :  { %v2254_v27 = vmul.f32 %v3223_v24, %v2252_v26 }
0x22de   :  { %2622 = vmatmul.mubr.msk.f32.vlgmr.msra.gmra.mrb[14].mxu1 %vm286_vm4, %v2254_v27 }
0x22df   :  { %2670 = vmatprep.mubr.msk.f32.mxu1 %vm3339_vm5, %v3335_v0  ;;  %2965 = vmatpush3.bf16.msra.mxu1 %v2964_v62 }
0x22e0   :  { %2966 = vmatprep.subr.bf16.mxu1 %v3338_v51 }
0x22e3   :  { %2968 = vmatpush3.bf16.msra.mxu1 %v2967_v40 }
0x23b1   :  { %v2326_v28 = vpop.f32.mrb[14].mxu1 }
0x23b2   :  { %v2328_v31 = vpop.f32.mrb[15].mxu1  ;;  %v2999_v36 = vadd.f32 %v2326_v28, %v3763_v58  ;;  %v2365_v58 = vld [vmem:[%s3927_s7 + $0x10] sm:$0xff] }
0x23b3   :  { %v3000_v35 = vadd.f32 %v2328_v31, %v3757_v55  ;;  %v2363_v55 = vld [vmem:[%s3927_s7] sm:$0xff]  ;;  %v2955_v22 = vpack.c.bf16 %v2366_v16, %v2365_v58 }
0x23b4   :  { %v2623_v37 = vmul.f32 -1.442695, %v2999_v36  ;;  %v2952_v52 = vpack.c.bf16 %v2364_v14, %v2363_v55 }
0x23b5   :  { %3224 = vtanh.f32 %v3000_v35  ;;  %v2624_v63 = vmul.f32 -1.442695, %v3000_v35 }
0x23b6   :  { %3226 = vpow2.f32 %v2623_v37  ;;  %2953 = vmatpush3.bf16.msra.mxu0 %v2952_v52 }
0x23b7   :  { %2954 = vmatprep.subr.bf16.mxu0 %v3338_v51 }
0x23ba   :  { %2956 = vmatpush3.bf16.msra.mxu0 %v2955_v22 }
0x23bb   :  { %2957 = vmatprep.subr.bf16.mxu0 %v3338_v51 }
0x23be   :  { %2959 = vmatpush3.bf16.msra.mxu0 %v2958_v29 }
0x23bf   :  { %v3225_v11 = vpop.eup %3224  ;;  %2960 = vmatprep.subr.bf16.mxu0 %v3338_v51 }
0x23c0   :  { %2348 = vrot.lane.b32.xlu1 %v3225_v11, %s3337_s30  ;;  %v3227_v38 = vpop.eup %3226 }
0x23c1   :  { %v2339_v39 = vadd.f32 1.0, %v3227_v38 }
0x23c2   :  { %2962 = vmatpush3.bf16.msra.mxu0 %v2961_v34 }
0x23c3   :  { %3228 = vrcp.f32 %v2339_v39 }
0x23cd   :  { %v3229_v44 = vpop.eup %3228 }
0x23ce   :  { %v2346_v56 = vmul.f32 %v3229_v44, %v2248_v17 }
0x2432   :  { %v2349_v45 = vpop.permute.xlu1 %2348 }
0x2433   :  { %v2351_v46 = vmul.f32 %v3229_v44, %v2349_v45 }
0x2435   :  { %2353 = vrot.lane.b32.xlu0 %v2351_v46, %s3337_s30 }
0x24a7   :  { %v2354_v57 = vpop.permute.xlu0 %2353 }
0x24a8   :  { %v2356_v59 = vadd.f32 %v2354_v57, %v2346_v56 }
0x24aa   :  { %3230 = vtanh.f32 %v2356_v59 }
0x24ab   :  { %3232 = vpow2.f32 %v2624_v63 }
0x24b4   :  { %v3231_v41 = vpop.eup %3230 }
0x24b5   :  { %2359 = vrot.lane.b32.xlu1 %v3231_v41, %s3337_s30  ;;  %v3233_v43 = vpop.eup %3232 }
0x24b6   :  { %v2340_v1 = vadd.f32 1.0, %v3233_v43 }
0x24b8   :  { %3234 = vrcp.f32 %v2340_v1 }
0x24c2   :  { %v3235_v0 = vpop.eup %3234 }
0x2527   :  { %v2360_v2 = vpop.permute.xlu1 %2359 }
0x2528   :  { %v2362_v3 = vmul.f32 %v3235_v0, %v2360_v2 }
0x252a   :  { %2660 = vmatmul.mubr.msk.f32.vlgmr.msra.gmra.mrb[16].mxu0 %vm286_vm4, %v2362_v3 }
0x25fd   :  { %v2447_v6 = vpop.f32.mrb[16].mxu0 }
0x25fe   :  { %v2448_v7 = vadd.f32 %v2625_v48, %v2447_v6  ;;  %v2661_v8 = vpop.f32.mrb[17].mxu0 }
0x2600   :  { %v2451_v9 = vmax.f32 %v2448_v7, 0.0 }
0x2602   :  { %2671 = vmatmul.mubr.msk.f32.vlgmr.msra.gmra.mrb[16].mxu1 %vm2463_vm6, %v2451_v9 }
0x26d5   :  { %v2533_v25 = vpop.f32.mrb[16].mxu1 }
0x26d6   :  { %v2534_v49 = vadd.f32 %v2627_v10, %v2533_v25  ;;  %v2672_v12 = vpop.f32.mrb[17].mxu1 }
0x26d8   :  { %2537 = vst [vmem:[#allocation10] sm:$0xff] %v2534_v49 }
0x26d9   :  { %3313 = shalt.err (!%p3310_p0)
}
0x26da   :  { %s3314_s18 = scalar_lea.hbm %s3931_s11, 128 }
0x26db   :  { %p3315_p1 = scmp.ne.s32.totalorder %s3931_s11, %s3314_s18  ;;  %p3318_p2 = scmp.lt.u32.totalorder %s3314_s18, %s3931_s11 }
0x26dd   :  { %p3320_p3 = pnand %p3318_p2, %p3315_p1 }
0x26df   :  { %3323 = shalt.err (!%p3320_p3)
}
0x26e0   :  { %2547 = dma.vmem_to_hbm [thread:$0]  %s2545_s23, 128, %s3931_s11, [#allocation6]  }
0x26e1   :  { %3328 = dma.done.wait [#allocation6], 128  }
0x26e2   :  { %3329 = vsyncadd [#allocation6], 4294967168 }
0x26e3   :  { %2551 = vsyncpa [#allocation5], 1 }
0x26e4   :  { %2552 = vsyncpa [#allocation8], 1 }
0x26e5   :  { %2553 = vsyncpa [#allocation6], 1 }

</bundles_post_ra>
